<compile_context>
chip_gen: v5e
topology: v5e:2x2
jax: 0.10.0
libtpu: 0.0.40
codegen_flags: <defaults>
</compile_context>

<pallas_src>
import functools
import math

import jax
import jax.numpy as jnp
from jax.experimental import pallas as pl
from jax.experimental.pallas import tpu as pltpu


# ----------------------------------------------------------------------------
# Fused kernel: 3x3 conv (shift + mask + matmul) + sinusoidal time-embedding MLP
# ----------------------------------------------------------------------------
def _fused_kernel(xp_ref, w_ref, bconv_ref, t_ref, freqs_ref,
                  w1c_ref, w1s_ref, b1_ref, w2_ref, b2_ref,
                  y_ref, emb_ref, *, H, W):
    HW = H * W
    Cout = y_ref.shape[1]
    base = W + 1                                  # left zero-pad width of the flat row

    xp = xp_ref[0]                                # (Cin, HW + 2W + 2), lane-dense

    # Column index of every output pixel; only the horizontal halo taps need masking
    # (the vertical halo is already zero thanks to the flat zero pad).
    col = jax.lax.broadcasted_iota(jnp.int32, (1, HW), 1) % W

    acc = jnp.zeros((Cout, HW), jnp.float32)
    for dy in range(3):
        for dx in range(3):
            off = (dy - 1) * W + (dx - 1)
            tap = xp[:, base + off: base + off + HW]          # (Cin, HW) static slice
            if dx == 0:                                        # left tap: col 0 is conv pad
                tap = jnp.where(col >= 1, tap, 0.0)
            elif dx == 2:                                      # right tap: col W-1 is conv pad
                tap = jnp.where(col <= W - 2, tap, 0.0)
            acc = acc + jnp.dot(w_ref[dy * 3 + dx], tap,       # (Cout,Cin)@(Cin,HW)
                                preferred_element_type=jnp.float32)

    # NCHW-flat, lane-dense store: (Cout, H*W) with H*W lanes.
    y_ref[0] = (acc + bconv_ref[...]).astype(y_ref.dtype)

    # ---- time embedding for this grid step's timestep -----------------------
    # proj = [cos(t*f), sin(t*f)]  (flip_sin_to_cos=True); proj @ W1 is split into
    # cos @ W1[:half] + sin @ W1[half:], which avoids an in-kernel concat.
    arg = t_ref[0] * freqs_ref[...]               # (1,1) * (1,half) -> (1,half)
    hid = (jnp.dot(jnp.cos(arg), w1c_ref[...], preferred_element_type=jnp.float32)
           + jnp.dot(jnp.sin(arg), w1s_ref[...], preferred_element_type=jnp.float32)
           + b1_ref[...])                         # (1, D)
    hid = hid * jax.nn.sigmoid(hid)               # SiLU (f32 on all generations)
    emb = jnp.dot(hid, w2_ref[...], preferred_element_type=jnp.float32) + b2_ref[...]
    emb_ref[0] = emb.astype(emb_ref.dtype)        # (1, D) block


# ----------------------------------------------------------------------------
# Full StrippedUNet forward (single pallas_call)
# ----------------------------------------------------------------------------
@jax.jit
def stripped_unet_forward(x, timesteps, params):
    conv_w, conv_b = params["conv_w"], params["conv_b"]
    B, Cin, H, W = x.shape
    Cout = conv_w.shape[0]
    half = Cout // 2
    D = params["w2"].shape[0]
    HW = H * W
    pad = W + 1

    # Cheap glue: NCHW -> (B, Cin, H*W) is a free reshape; one 1-D zero pad of the last
    # dim replaces both the conv's vertical zero-padding and any layout transpose.
    xflat = x.reshape(B, Cin, HW).astype(jnp.float32)
    xpad = jnp.pad(xflat, ((0, 0), (0, 0), (pad, pad)))         # (B, Cin, HW + 2W + 2)

    # conv weight as 9 taps of (Cout, Cin), tap index t = dy*3 + dx
    w_r = jnp.transpose(conv_w, (2, 3, 0, 1)).reshape(9, Cout, Cin).astype(jnp.float32)
    bconv = conv_b.reshape(Cout, 1).astype(jnp.float32)

    t3 = timesteps.astype(jnp.float32).reshape(B, 1, 1)
    freqs2 = params["freqs"].reshape(1, half).astype(jnp.float32)
    w1 = params["w1"].astype(jnp.float32)
    w1c, w1s = w1[:half], w1[half:]
    b1 = params["b1"].reshape(1, D).astype(jnp.float32)
    w2 = params["w2"].astype(jnp.float32)
    b2 = params["b2"].reshape(1, D).astype(jnp.float32)

    kernel = functools.partial(_fused_kernel, H=H, W=W)

    y_flat, emb3 = pl.pallas_call(
        kernel,
        out_shape=(
            jax.ShapeDtypeStruct((B, Cout, HW), jnp.float32),   # NCHW-flat conv out
            jax.ShapeDtypeStruct((B, 1, D), jnp.float32),       # time embedding
        ),
        grid=(B,),
        in_specs=[
            pl.BlockSpec((1, Cin, HW + 2 * pad), lambda b: (b, 0, 0)),  # flat padded image b
            pl.BlockSpec((9, Cout, Cin),         lambda b: (0, 0, 0)),  # conv taps
            pl.BlockSpec((Cout, 1),              lambda b: (0, 0)),     # conv bias
            pl.BlockSpec((1, 1, 1),              lambda b: (b, 0, 0)),  # timestep b
            pl.BlockSpec((1, half),              lambda b: (0, 0)),     # sinusoid freqs
            pl.BlockSpec((half, D),              lambda b: (0, 0)),     # W1[:half]
            pl.BlockSpec((half, D),              lambda b: (0, 0)),     # W1[half:]
            pl.BlockSpec((1, D),                 lambda b: (0, 0)),     # b1
            pl.BlockSpec((D, D),                 lambda b: (0, 0)),     # W2
            pl.BlockSpec((1, D),                 lambda b: (0, 0)),     # b2
        ],
        out_specs=(
            pl.BlockSpec((1, Cout, HW), lambda b: (b, 0, 0)),
            pl.BlockSpec((1, 1, D),     lambda b: (b, 0, 0)),
        ),
        compiler_params=pltpu.CompilerParams(
            dimension_semantics=("parallel",)),
    )(xpad, w_r, bconv, t3, freqs2, w1c, w1s, b1, w2, b2)

    y = y_flat.reshape(B, Cout, H, W)     # free: contiguous split of the last dim
    emb = emb3.reshape(B, D)              # free: drop the singleton dim
    return y, emb


# ----------------------------------------------------------------------------
# Deterministic parameter construction (synthetic weights)
# ----------------------------------------------------------------------------
def make_params(key, cin=4, cout=32, time_embed_dim=128):
    ks = jax.random.split(key, 6)
    conv_w = 0.02 * jax.random.normal(ks[0], (cout, cin, 3, 3), jnp.float32)
    conv_b = 0.02 * jax.random.normal(ks[1], (cout,), jnp.float32)
    w1 = 0.02 * jax.random.normal(ks[2], (cout, time_embed_dim), jnp.float32)
    b1 = 0.02 * jax.random.normal(ks[3], (time_embed_dim,), jnp.float32)
    w2 = 0.02 * jax.random.normal(ks[4], (time_embed_dim, time_embed_dim), jnp.float32)
    b2 = 0.02 * jax.random.normal(ks[5], (time_embed_dim,), jnp.float32)

    # diffusers Timesteps(cout, flip_sin_to_cos=True, downscale_freq_shift=0)
    half = cout // 2
    exponent = -math.log(10000.0) * jnp.arange(half, dtype=jnp.float32) / half
    freqs = jnp.exp(exponent)                                       # (half,)
    return dict(conv_w=conv_w, conv_b=conv_b, w1=w1, b1=b1, w2=w2, b2=b2,
                freqs=freqs)


# ----------------------------------------------------------------------------
# Pure-JAX reference (for correctness check)
# ----------------------------------------------------------------------------
def reference_forward(x, timesteps, params):
    y = jax.lax.conv_general_dilated(
        x, params["conv_w"], window_strides=(1, 1),
        padding=((1, 1), (1, 1)),
        dimension_numbers=("NCHW", "OIHW", "NCHW"))
    y = y + params["conv_b"][None, :, None, None]

    freqs = params["freqs"]
    arg = timesteps.astype(jnp.float32)[:, None] * freqs[None, :]
    proj = jnp.concatenate([jnp.cos(arg), jnp.sin(arg)], axis=-1)   # flip_sin_to_cos
    h = proj @ params["w1"] + params["b1"]
    h = h * jax.nn.sigmoid(h)
    emb = h @ params["w2"] + params["b2"]
    return y, emb


if __name__ == "__main__":
    key = jax.random.PRNGKey(0)
    k_x, k_t, k_p = jax.random.split(key, 3)

    B, Cin, H, W = 2, 4, 16, 16
    x = jax.random.normal(k_x, (B, Cin, H, W), jnp.float32)
    timesteps = jax.random.randint(k_t, (B,), 0, 1000).astype(jnp.float32)
    params = make_params(k_p, cin=Cin, cout=32, time_embed_dim=128)

    y, emb = stripped_unet_forward(x, timesteps, params)
    y, emb = jax.block_until_ready((y, emb))

    y_ref, emb_ref = reference_forward(x, timesteps, params)
    assert y.shape == (B, 32, H, W) and emb.shape == (B, 128)
    assert jnp.allclose(y, y_ref, atol=2e-3, rtol=2e-3)
    assert jnp.allclose(emb, emb_ref, atol=2e-3, rtol=2e-3)

    print("KERNEL_OK")
</pallas_src>

<mosaic_0001>
module attributes {stable_mosaic.version = 11 : i64} {
  func.func @_fused_kernel(%arg0: i32, %arg1: memref<1x4x290xf32, #tpu.memory_space<vmem>>, %arg2: memref<9x32x4xf32, #tpu.memory_space<vmem>>, %arg3: memref<32x1xf32, #tpu.memory_space<vmem>>, %arg4: memref<1x1x1xf32, #tpu.memory_space<vmem>>, %arg5: memref<1x16xf32, #tpu.memory_space<vmem>>, %arg6: memref<16x128xf32, #tpu.memory_space<vmem>>, %arg7: memref<16x128xf32, #tpu.memory_space<vmem>>, %arg8: memref<1x128xf32, #tpu.memory_space<vmem>>, %arg9: memref<128x128xf32, #tpu.memory_space<vmem>>, %arg10: memref<1x128xf32, #tpu.memory_space<vmem>>, %arg11: memref<1x32x256xf32, #tpu.memory_space<vmem>>, %arg12: memref<1x1x128xf32, #tpu.memory_space<vmem>>) attributes {dimension_semantics = [#tpu.dimension_semantics<parallel>], iteration_bounds = array<i64: 2>, scalar_prefetch = 0 : i64, scratch_operands = 0 : i64, tpu.core_type = #tpu.core_type<tc>, window_params = [{transform_indices = @transform_0, window_bounds = array<i64: 1, 4, 290>}, {pipeline_mode = #tpu.pipeline_mode<synchronous>, transform_indices = @transform_1, window_bounds = array<i64: 9, 32, 4>}, {pipeline_mode = #tpu.pipeline_mode<synchronous>, transform_indices = @transform_2, window_bounds = array<i64: 32, 1>}, {transform_indices = @transform_3, window_bounds = array<i64: 1, 1, 1>}, {pipeline_mode = #tpu.pipeline_mode<synchronous>, transform_indices = @transform_4, window_bounds = array<i64: 1, 16>}, {pipeline_mode = #tpu.pipeline_mode<synchronous>, transform_indices = @transform_5, window_bounds = array<i64: 16, 128>}, {pipeline_mode = #tpu.pipeline_mode<synchronous>, transform_indices = @transform_6, window_bounds = array<i64: 16, 128>}, {pipeline_mode = #tpu.pipeline_mode<synchronous>, transform_indices = @transform_7, window_bounds = array<i64: 1, 128>}, {pipeline_mode = #tpu.pipeline_mode<synchronous>, transform_indices = @transform_8, window_bounds = array<i64: 128, 128>}, {pipeline_mode = #tpu.pipeline_mode<synchronous>, transform_indices = @transform_9, window_bounds = array<i64: 1, 128>}, {transform_indices = @transform_10, window_bounds = array<i64: 1, 32, 256>}, {transform_indices = @transform_11, window_bounds = array<i64: 1, 1, 128>}]} {
    %c0 = arith.constant 0 : index
    %c0_0 = arith.constant 0 : index
    %c0_1 = arith.constant 0 : index
    %0 = vector.load %arg1[%c0, %c0_0, %c0_1] : memref<1x4x290xf32, #tpu.memory_space<vmem>>, vector<1x4x290xf32>
    %1 = vector.shape_cast %0 : vector<1x4x290xf32> to vector<4x290xf32>
    %2 = tpu.iota {dimensions = array<i32: 1>} : vector<1x256xi32>
    %c16_i32 = arith.constant 16 : i32
    %c0_i32 = arith.constant 0 : i32
    %3 = arith.cmpi eq, %c16_i32, %c0_i32 : i32
    %c1_i32 = arith.constant 1 : i32
    %4 = arith.select %3, %c1_i32, %c16_i32 : i32
    %5 = vector.broadcast %4 : i32 to vector<1x256xi32>
    %6 = arith.remsi %2, %5 : vector<1x256xi32>
    %c0_i32_2 = arith.constant 0 : i32
    %7 = vector.broadcast %c0_i32_2 : i32 to vector<1x256xi32>
    %8 = arith.cmpi ne, %6, %7 : vector<1x256xi32>
    %c0_i32_3 = arith.constant 0 : i32
    %9 = vector.broadcast %c0_i32_3 : i32 to vector<1x256xi32>
    %10 = arith.cmpi slt, %6, %9 : vector<1x256xi32>
    %c0_i32_4 = arith.constant 0 : i32
    %11 = arith.cmpi slt, %4, %c0_i32_4 : i32
    %12 = vector.broadcast %11 : i1 to vector<1x256xi1>
    %13 = vector.broadcast %12 : vector<1x256xi1> to vector<1x256xi1>
    %14 = arith.xori %10, %13 : vector<1x256xi1>
    %15 = arith.andi %14, %8 : vector<1x256xi1>
    %16 = vector.broadcast %4 : i32 to vector<1x256xi32>
    %17 = arith.addi %6, %16 : vector<1x256xi32>
    %18 = arith.select %15, %17, %6 : vector<1x256xi1>, vector<1x256xi32>
    %cst = arith.constant 0.000000e+00 : f32
    %19 = vector.broadcast %cst : f32 to vector<32x256xf32>
    %20 = vector.extract_strided_slice %1 {offsets = [0, 0], sizes = [4, 256], strides = [1, 1]} : vector<4x290xf32> to vector<4x256xf32>
    %c1_i32_5 = arith.constant 1 : i32
    %21 = vector.broadcast %c1_i32_5 : i32 to vector<1x256xi32>
    %22 = arith.cmpi sge, %18, %21 : vector<1x256xi32>
    %cst_6 = arith.constant 0.000000e+00 : f32
    %23 = vector.shape_cast %22 : vector<1x256xi1> to vector<1x256xi1>
    %24 = vector.broadcast %23 : vector<1x256xi1> to vector<4x256xi1>
    %25 = vector.broadcast %cst_6 : f32 to vector<4x256xf32>
    %26 = arith.select %24, %20, %25 : vector<4x256xi1>, vector<4x256xf32>
    %c0_7 = arith.constant 0 : index
    %c0_8 = arith.constant 0 : index
    %c0_9 = arith.constant 0 : index
    %27 = vector.load %arg2[%c0_7, %c0_8, %c0_9] : memref<9x32x4xf32, #tpu.memory_space<vmem>>, vector<1x32x4xf32>
    %28 = vector.shape_cast %27 : vector<1x32x4xf32> to vector<32x4xf32>
    %cst_10 = arith.constant dense<0.000000e+00> : vector<32x256xf32>
    %29 = tpu.matmul %28, %26, %cst_10 {dimension_numbers = #tpu.dot_dimension_numbers<[1], [0], [0], [1], [0, 0, 1, 1], [], []>} : vector<32x4xf32>, vector<4x256xf32>, vector<32x256xf32> -> vector<32x256xf32>
    %30 = arith.addf %19, %29 : vector<32x256xf32>
    %31 = vector.extract_strided_slice %1 {offsets = [0, 1], sizes = [4, 256], strides = [1, 1]} : vector<4x290xf32> to vector<4x256xf32>
    %c1 = arith.constant 1 : index
    %c0_11 = arith.constant 0 : index
    %c0_12 = arith.constant 0 : index
    %32 = vector.load %arg2[%c1, %c0_11, %c0_12] : memref<9x32x4xf32, #tpu.memory_space<vmem>>, vector<1x32x4xf32>
    %33 = vector.shape_cast %32 : vector<1x32x4xf32> to vector<32x4xf32>
    %cst_13 = arith.constant dense<0.000000e+00> : vector<32x256xf32>
    %34 = tpu.matmul %33, %31, %cst_13 {dimension_numbers = #tpu.dot_dimension_numbers<[1], [0], [0], [1], [0, 0, 1, 1], [], []>} : vector<32x4xf32>, vector<4x256xf32>, vector<32x256xf32> -> vector<32x256xf32>
    %35 = arith.addf %30, %34 : vector<32x256xf32>
    %36 = vector.extract_strided_slice %1 {offsets = [0, 2], sizes = [4, 256], strides = [1, 1]} : vector<4x290xf32> to vector<4x256xf32>
    %c14_i32 = arith.constant 14 : i32
    %37 = vector.broadcast %c14_i32 : i32 to vector<1x256xi32>
    %38 = arith.cmpi sle, %18, %37 : vector<1x256xi32>
    %cst_14 = arith.constant 0.000000e+00 : f32
    %39 = vector.shape_cast %38 : vector<1x256xi1> to vector<1x256xi1>
    %40 = vector.broadcast %39 : vector<1x256xi1> to vector<4x256xi1>
    %41 = vector.broadcast %cst_14 : f32 to vector<4x256xf32>
    %42 = arith.select %40, %36, %41 : vector<4x256xi1>, vector<4x256xf32>
    %c2 = arith.constant 2 : index
    %c0_15 = arith.constant 0 : index
    %c0_16 = arith.constant 0 : index
    %43 = vector.load %arg2[%c2, %c0_15, %c0_16] : memref<9x32x4xf32, #tpu.memory_space<vmem>>, vector<1x32x4xf32>
    %44 = vector.shape_cast %43 : vector<1x32x4xf32> to vector<32x4xf32>
    %cst_17 = arith.constant dense<0.000000e+00> : vector<32x256xf32>
    %45 = tpu.matmul %44, %42, %cst_17 {dimension_numbers = #tpu.dot_dimension_numbers<[1], [0], [0], [1], [0, 0, 1, 1], [], []>} : vector<32x4xf32>, vector<4x256xf32>, vector<32x256xf32> -> vector<32x256xf32>
    %46 = arith.addf %35, %45 : vector<32x256xf32>
    %47 = vector.extract_strided_slice %1 {offsets = [0, 16], sizes = [4, 256], strides = [1, 1]} : vector<4x290xf32> to vector<4x256xf32>
    %c1_i32_18 = arith.constant 1 : i32
    %48 = vector.broadcast %c1_i32_18 : i32 to vector<1x256xi32>
    %49 = arith.cmpi sge, %18, %48 : vector<1x256xi32>
    %cst_19 = arith.constant 0.000000e+00 : f32
    %50 = vector.shape_cast %49 : vector<1x256xi1> to vector<1x256xi1>
    %51 = vector.broadcast %50 : vector<1x256xi1> to vector<4x256xi1>
    %52 = vector.broadcast %cst_19 : f32 to vector<4x256xf32>
    %53 = arith.select %51, %47, %52 : vector<4x256xi1>, vector<4x256xf32>
    %c3 = arith.constant 3 : index
    %c0_20 = arith.constant 0 : index
    %c0_21 = arith.constant 0 : index
    %54 = vector.load %arg2[%c3, %c0_20, %c0_21] : memref<9x32x4xf32, #tpu.memory_space<vmem>>, vector<1x32x4xf32>
    %55 = vector.shape_cast %54 : vector<1x32x4xf32> to vector<32x4xf32>
    %cst_22 = arith.constant dense<0.000000e+00> : vector<32x256xf32>
    %56 = tpu.matmul %55, %53, %cst_22 {dimension_numbers = #tpu.dot_dimension_numbers<[1], [0], [0], [1], [0, 0, 1, 1], [], []>} : vector<32x4xf32>, vector<4x256xf32>, vector<32x256xf32> -> vector<32x256xf32>
    %57 = arith.addf %46, %56 : vector<32x256xf32>
    %58 = vector.extract_strided_slice %1 {offsets = [0, 17], sizes = [4, 256], strides = [1, 1]} : vector<4x290xf32> to vector<4x256xf32>
    %c4 = arith.constant 4 : index
    %c0_23 = arith.constant 0 : index
    %c0_24 = arith.constant 0 : index
    %59 = vector.load %arg2[%c4, %c0_23, %c0_24] : memref<9x32x4xf32, #tpu.memory_space<vmem>>, vector<1x32x4xf32>
    %60 = vector.shape_cast %59 : vector<1x32x4xf32> to vector<32x4xf32>
    %cst_25 = arith.constant dense<0.000000e+00> : vector<32x256xf32>
    %61 = tpu.matmul %60, %58, %cst_25 {dimension_numbers = #tpu.dot_dimension_numbers<[1], [0], [0], [1], [0, 0, 1, 1], [], []>} : vector<32x4xf32>, vector<4x256xf32>, vector<32x256xf32> -> vector<32x256xf32>
    %62 = arith.addf %57, %61 : vector<32x256xf32>
    %63 = vector.extract_strided_slice %1 {offsets = [0, 18], sizes = [4, 256], strides = [1, 1]} : vector<4x290xf32> to vector<4x256xf32>
    %c14_i32_26 = arith.constant 14 : i32
    %64 = vector.broadcast %c14_i32_26 : i32 to vector<1x256xi32>
    %65 = arith.cmpi sle, %18, %64 : vector<1x256xi32>
    %cst_27 = arith.constant 0.000000e+00 : f32
    %66 = vector.shape_cast %65 : vector<1x256xi1> to vector<1x256xi1>
    %67 = vector.broadcast %66 : vector<1x256xi1> to vector<4x256xi1>
    %68 = vector.broadcast %cst_27 : f32 to vector<4x256xf32>
    %69 = arith.select %67, %63, %68 : vector<4x256xi1>, vector<4x256xf32>
    %c5 = arith.constant 5 : index
    %c0_28 = arith.constant 0 : index
    %c0_29 = arith.constant 0 : index
    %70 = vector.load %arg2[%c5, %c0_28, %c0_29] : memref<9x32x4xf32, #tpu.memory_space<vmem>>, vector<1x32x4xf32>
    %71 = vector.shape_cast %70 : vector<1x32x4xf32> to vector<32x4xf32>
    %cst_30 = arith.constant dense<0.000000e+00> : vector<32x256xf32>
    %72 = tpu.matmul %71, %69, %cst_30 {dimension_numbers = #tpu.dot_dimension_numbers<[1], [0], [0], [1], [0, 0, 1, 1], [], []>} : vector<32x4xf32>, vector<4x256xf32>, vector<32x256xf32> -> vector<32x256xf32>
    %73 = arith.addf %62, %72 : vector<32x256xf32>
    %74 = vector.extract_strided_slice %1 {offsets = [0, 32], sizes = [4, 256], strides = [1, 1]} : vector<4x290xf32> to vector<4x256xf32>
    %c1_i32_31 = arith.constant 1 : i32
    %75 = vector.broadcast %c1_i32_31 : i32 to vector<1x256xi32>
    %76 = arith.cmpi sge, %18, %75 : vector<1x256xi32>
    %cst_32 = arith.constant 0.000000e+00 : f32
    %77 = vector.shape_cast %76 : vector<1x256xi1> to vector<1x256xi1>
    %78 = vector.broadcast %77 : vector<1x256xi1> to vector<4x256xi1>
    %79 = vector.broadcast %cst_32 : f32 to vector<4x256xf32>
    %80 = arith.select %78, %74, %79 : vector<4x256xi1>, vector<4x256xf32>
    %c6 = arith.constant 6 : index
    %c0_33 = arith.constant 0 : index
    %c0_34 = arith.constant 0 : index
    %81 = vector.load %arg2[%c6, %c0_33, %c0_34] : memref<9x32x4xf32, #tpu.memory_space<vmem>>, vector<1x32x4xf32>
    %82 = vector.shape_cast %81 : vector<1x32x4xf32> to vector<32x4xf32>
    %cst_35 = arith.constant dense<0.000000e+00> : vector<32x256xf32>
    %83 = tpu.matmul %82, %80, %cst_35 {dimension_numbers = #tpu.dot_dimension_numbers<[1], [0], [0], [1], [0, 0, 1, 1], [], []>} : vector<32x4xf32>, vector<4x256xf32>, vector<32x256xf32> -> vector<32x256xf32>
    %84 = arith.addf %73, %83 : vector<32x256xf32>
    %85 = vector.extract_strided_slice %1 {offsets = [0, 33], sizes = [4, 256], strides = [1, 1]} : vector<4x290xf32> to vector<4x256xf32>
    %c7 = arith.constant 7 : index
    %c0_36 = arith.constant 0 : index
    %c0_37 = arith.constant 0 : index
    %86 = vector.load %arg2[%c7, %c0_36, %c0_37] : memref<9x32x4xf32, #tpu.memory_space<vmem>>, vector<1x32x4xf32>
    %87 = vector.shape_cast %86 : vector<1x32x4xf32> to vector<32x4xf32>
    %cst_38 = arith.constant dense<0.000000e+00> : vector<32x256xf32>
    %88 = tpu.matmul %87, %85, %cst_38 {dimension_numbers = #tpu.dot_dimension_numbers<[1], [0], [0], [1], [0, 0, 1, 1], [], []>} : vector<32x4xf32>, vector<4x256xf32>, vector<32x256xf32> -> vector<32x256xf32>
    %89 = arith.addf %84, %88 : vector<32x256xf32>
    %90 = vector.extract_strided_slice %1 {offsets = [0, 34], sizes = [4, 256], strides = [1, 1]} : vector<4x290xf32> to vector<4x256xf32>
    %c14_i32_39 = arith.constant 14 : i32
    %91 = vector.broadcast %c14_i32_39 : i32 to vector<1x256xi32>
    %92 = arith.cmpi sle, %18, %91 : vector<1x256xi32>
    %cst_40 = arith.constant 0.000000e+00 : f32
    %93 = vector.shape_cast %92 : vector<1x256xi1> to vector<1x256xi1>
    %94 = vector.broadcast %93 : vector<1x256xi1> to vector<4x256xi1>
    %95 = vector.broadcast %cst_40 : f32 to vector<4x256xf32>
    %96 = arith.select %94, %90, %95 : vector<4x256xi1>, vector<4x256xf32>
    %c8 = arith.constant 8 : index
    %c0_41 = arith.constant 0 : index
    %c0_42 = arith.constant 0 : index
    %97 = vector.load %arg2[%c8, %c0_41, %c0_42] : memref<9x32x4xf32, #tpu.memory_space<vmem>>, vector<1x32x4xf32>
    %98 = vector.shape_cast %97 : vector<1x32x4xf32> to vector<32x4xf32>
    %cst_43 = arith.constant dense<0.000000e+00> : vector<32x256xf32>
    %99 = tpu.matmul %98, %96, %cst_43 {dimension_numbers = #tpu.dot_dimension_numbers<[1], [0], [0], [1], [0, 0, 1, 1], [], []>} : vector<32x4xf32>, vector<4x256xf32>, vector<32x256xf32> -> vector<32x256xf32>
    %100 = arith.addf %89, %99 : vector<32x256xf32>
    %c0_44 = arith.constant 0 : index
    %c0_45 = arith.constant 0 : index
    %101 = vector.load %arg3[%c0_44, %c0_45] : memref<32x1xf32, #tpu.memory_space<vmem>>, vector<32x1xf32>
    %102 = vector.broadcast %101 : vector<32x1xf32> to vector<32x256xf32>
    %103 = arith.addf %100, %102 : vector<32x256xf32>
    %c0_46 = arith.constant 0 : index
    %c0_47 = arith.constant 0 : index
    %c0_48 = arith.constant 0 : index
    %104 = vector.load %arg11[%c0_46, %c0_47, %c0_48] : memref<1x32x256xf32, #tpu.memory_space<vmem>>, vector<1x32x256xf32>
    %105 = vector.shape_cast %104 : vector<1x32x256xf32> to vector<32x256xf32>
    %106 = vector.shape_cast %103 : vector<32x256xf32> to vector<1x32x256xf32>
    tpu.vector_store %arg11[%c0_46, %c0_47, %c0_48], %106 {strides = array<i32>} : memref<1x32x256xf32, #tpu.memory_space<vmem>>, vector<1x32x256xf32>,
    %c0_49 = arith.constant 0 : index
    %c0_50 = arith.constant 0 : index
    %c0_51 = arith.constant 0 : index
    %107 = vector.load %arg4[%c0_49, %c0_50, %c0_51] : memref<1x1x1xf32, #tpu.memory_space<vmem>>, vector<1x1x1xf32>
    %108 = vector.shape_cast %107 : vector<1x1x1xf32> to vector<1x1xf32>
    %c0_52 = arith.constant 0 : index
    %c0_53 = arith.constant 0 : index
    %109 = vector.load %arg5[%c0_52, %c0_53] : memref<1x16xf32, #tpu.memory_space<vmem>>, vector<1x16xf32>
    %110 = vector.broadcast %108 : vector<1x1xf32> to vector<1x16xf32>
    %111 = arith.mulf %110, %109 : vector<1x16xf32>
    %112 = math.cos %111 : vector<1x16xf32>
    %c0_54 = arith.constant 0 : index
    %c0_55 = arith.constant 0 : index
    %113 = vector.load %arg6[%c0_54, %c0_55] : memref<16x128xf32, #tpu.memory_space<vmem>>, vector<16x128xf32>
    %cst_56 = arith.constant dense<0.000000e+00> : vector<1x128xf32>
    %114 = tpu.matmul %112, %113, %cst_56 {dimension_numbers = #tpu.dot_dimension_numbers<[1], [0], [0], [1], [0, 0, 1, 1], [], []>} : vector<1x16xf32>, vector<16x128xf32>, vector<1x128xf32> -> vector<1x128xf32>
    %115 = math.sin %111 : vector<1x16xf32>
    %c0_57 = arith.constant 0 : index
    %c0_58 = arith.constant 0 : index
    %116 = vector.load %arg7[%c0_57, %c0_58] : memref<16x128xf32, #tpu.memory_space<vmem>>, vector<16x128xf32>
    %cst_59 = arith.constant dense<0.000000e+00> : vector<1x128xf32>
    %117 = tpu.matmul %115, %116, %cst_59 {dimension_numbers = #tpu.dot_dimension_numbers<[1], [0], [0], [1], [0, 0, 1, 1], [], []>} : vector<1x16xf32>, vector<16x128xf32>, vector<1x128xf32> -> vector<1x128xf32>
    %118 = arith.addf %114, %117 : vector<1x128xf32>
    %c0_60 = arith.constant 0 : index
    %c0_61 = arith.constant 0 : index
    %119 = vector.load %arg8[%c0_60, %c0_61] : memref<1x128xf32, #tpu.memory_space<vmem>>, vector<1x128xf32>
    %120 = arith.addf %118, %119 : vector<1x128xf32>
    %121 = arith.negf %120 : vector<1x128xf32>
    %122 = math.exp %121 : vector<1x128xf32>
    %cst_62 = arith.constant 1.000000e+00 : f32
    %123 = vector.broadcast %cst_62 : f32 to vector<1x128xf32>
    %124 = arith.addf %123, %122 : vector<1x128xf32>
    %125 = arith.divf %123, %124 : vector<1x128xf32>
    %126 = arith.mulf %120, %125 : vector<1x128xf32>
    %c0_63 = arith.constant 0 : index
    %c0_64 = arith.constant 0 : index
    %127 = vector.load %arg9[%c0_63, %c0_64] : memref<128x128xf32, #tpu.memory_space<vmem>>, vector<128x128xf32>
    %cst_65 = arith.constant dense<0.000000e+00> : vector<1x128xf32>
    %128 = tpu.matmul %126, %127, %cst_65 {dimension_numbers = #tpu.dot_dimension_numbers<[1], [0], [0], [1], [0, 0, 1, 1], [], []>} : vector<1x128xf32>, vector<128x128xf32>, vector<1x128xf32> -> vector<1x128xf32>
    %c0_66 = arith.constant 0 : index
    %c0_67 = arith.constant 0 : index
    %129 = vector.load %arg10[%c0_66, %c0_67] : memref<1x128xf32, #tpu.memory_space<vmem>>, vector<1x128xf32>
    %130 = arith.addf %128, %129 : vector<1x128xf32>
    %c0_68 = arith.constant 0 : index
    %c0_69 = arith.constant 0 : index
    %c0_70 = arith.constant 0 : index
    %131 = vector.load %arg12[%c0_68, %c0_69, %c0_70] : memref<1x1x128xf32, #tpu.memory_space<vmem>>, vector<1x1x128xf32>
    %132 = vector.shape_cast %131 : vector<1x1x128xf32> to vector<1x128xf32>
    %133 = vector.shape_cast %130 : vector<1x128xf32> to vector<1x1x128xf32>
    tpu.vector_store %arg12[%c0_68, %c0_69, %c0_70], %133 {strides = array<i32>} : memref<1x1x128xf32, #tpu.memory_space<vmem>>, vector<1x1x128xf32>,
    return
  }
  func.func @transform_0(%arg0: i32) -> (i32, i32, i32) {
    %c0_i32 = arith.constant 0 : i32
    %c0_i32_0 = arith.constant 0 : i32
    %c0_i32_1 = arith.constant 0 : i32
    return %arg0, %c0_i32, %c0_i32_0 : i32, i32, i32
  }
  func.func @transform_1(%arg0: i32) -> (i32, i32, i32) {
    %c0_i32 = arith.constant 0 : i32
    %c0_i32_0 = arith.constant 0 : i32
    %c0_i32_1 = arith.constant 0 : i32
    %c0_i32_2 = arith.constant 0 : i32
    return %c0_i32, %c0_i32_0, %c0_i32_1 : i32, i32, i32
  }
  func.func @transform_2(%arg0: i32) -> (i32, i32) {
    %c0_i32 = arith.constant 0 : i32
    %c0_i32_0 = arith.constant 0 : i32
    %c0_i32_1 = arith.constant 0 : i32
    return %c0_i32, %c0_i32_0 : i32, i32
  }
  func.func @transform_3(%arg0: i32) -> (i32, i32, i32) {
    %c0_i32 = arith.constant 0 : i32
    %c0_i32_0 = arith.constant 0 : i32
    %c0_i32_1 = arith.constant 0 : i32
    return %arg0, %c0_i32, %c0_i32_0 : i32, i32, i32
  }
  func.func @transform_4(%arg0: i32) -> (i32, i32) {
    %c0_i32 = arith.constant 0 : i32
    %c0_i32_0 = arith.constant 0 : i32
    %c0_i32_1 = arith.constant 0 : i32
    return %c0_i32, %c0_i32_0 : i32, i32
  }
  func.func @transform_5(%arg0: i32) -> (i32, i32) {
    %c0_i32 = arith.constant 0 : i32
    %c0_i32_0 = arith.constant 0 : i32
    %c0_i32_1 = arith.constant 0 : i32
    return %c0_i32, %c0_i32_0 : i32, i32
  }
  func.func @transform_6(%arg0: i32) -> (i32, i32) {
    %c0_i32 = arith.constant 0 : i32
    %c0_i32_0 = arith.constant 0 : i32
    %c0_i32_1 = arith.constant 0 : i32
    return %c0_i32, %c0_i32_0 : i32, i32
  }
  func.func @transform_7(%arg0: i32) -> (i32, i32) {
    %c0_i32 = arith.constant 0 : i32
    %c0_i32_0 = arith.constant 0 : i32
    %c0_i32_1 = arith.constant 0 : i32
    return %c0_i32, %c0_i32_0 : i32, i32
  }
  func.func @transform_8(%arg0: i32) -> (i32, i32) {
    %c0_i32 = arith.constant 0 : i32
    %c0_i32_0 = arith.constant 0 : i32
    %c0_i32_1 = arith.constant 0 : i32
    return %c0_i32, %c0_i32_0 : i32, i32
  }
  func.func @transform_9(%arg0: i32) -> (i32, i32) {
    %c0_i32 = arith.constant 0 : i32
    %c0_i32_0 = arith.constant 0 : i32
    %c0_i32_1 = arith.constant 0 : i32
    return %c0_i32, %c0_i32_0 : i32, i32
  }
  func.func @transform_10(%arg0: i32) -> (i32, i32, i32) {
    %c0_i32 = arith.constant 0 : i32
    %c0_i32_0 = arith.constant 0 : i32
    %c0_i32_1 = arith.constant 0 : i32
    return %arg0, %c0_i32, %c0_i32_0 : i32, i32, i32
  }
  func.func @transform_11(%arg0: i32) -> (i32, i32, i32) {
    %c0_i32 = arith.constant 0 : i32
    %c0_i32_0 = arith.constant 0 : i32
    %c0_i32_1 = arith.constant 0 : i32
    return %arg0, %c0_i32, %c0_i32_0 : i32, i32, i32
  }
}

</mosaic_0001>

<bundles_post_ra>
// kernel: stripped_unet_forward.1
= control target key start
LH: loop header
LB: loop body
LE: loop exit
PB: predicated region body
PF: predicated region fallthrough
CT: control target
= control target key end

     0   :  { %s2933_s0 = inlined_call_operand.vmem [shape: f32[2,4,290], index: 0, kind: input, shape index: {}]   ;;  %s2934_s1 = inlined_call_operand.vmem [shape: f32[9,32,4], index: 1, kind: input, shape index: {}]   ;;  %s2935_s2 = inlined_call_operand.vmem [shape: f32[32,1], index: 2, kind: input, shape index: {}]   ;;  %s2936_s3 = inlined_call_operand.vmem [shape: f32[2,1,1], index: 3, kind: input, shape index: {}]   ;;  %s2937_s4 = inlined_call_operand.vmem [shape: f32[1,16], index: 4, kind: input, shape index: {}]   ;;  %s2938_s5 = inlined_call_operand.vmem [shape: f32[16,128], index: 5, kind: input, shape index: {}]   ;;  %s2939_s6 = inlined_call_operand.vmem [shape: f32[16,128], index: 6, kind: input, shape index: {}]   ;;  %s2940_s7 = inlined_call_operand.vmem [shape: f32[1,128], index: 7, kind: input, shape index: {}]   ;;  %s2941_s8 = inlined_call_operand.vmem [shape: f32[128,128], index: 8, kind: input, shape index: {}]   ;;  %s2942_s9 = inlined_call_operand.vmem [shape: f32[1,128], index: 9, kind: input, shape index: {}]   ;;  %s2943_s10 = inlined_call_operand.vmem [shape: f32[2,32,256], index: 10, kind: output, shape index: {0}]   ;;  %s2944_s11 = inlined_call_operand.hbm [shape: f32[2,1,128], index: 11, kind: output, shape index: {1}]  }
   0x1   :  { %2945 = sst [smem:[#allocation5_spill]] %s2933_s0 }
   0x2   :  { %2946 = sst [smem:[#allocation6_spill]] %s2934_s1 }
   0x3   :  { %17 = vsyncpa [#allocation3], 0 }
   0x4   :  { %19 = vsyncpa [#allocation3 + $0x1], 0  ;;  %s2304_s17 = smov 0   ;;  %s2306_s18 = smov 0  }
   0x5   :  { %s2308_s19 = smov 0   ;;  %s2310_s20 = smov 0  }
   0x6 LB: > { %s2325_s21 = sadd.s32 4294967295, %s2227_s20   ;;  %s1960_s22 = sadd.s32 4294967294, %s2227_s20   ;;  %s2227_s20 = sphi %s2310_s20, %s2964_s20   ;;  %s2223_s19 = sphi %s2308_s19, %s2963_s19   ;;  %s2219_s18 = sphi %s2306_s18, %s2962_s18   ;;  %s2215_s17 = sphi %s2304_s17, %s2961_s17  }
   0x7   : > { %s2329_s23 = sadd.s32 1, %s2227_s20   ;;  %s278_s24 = sadd.s32 1, %s2223_s19 }
   0x8   : > { %s275_s25 = ssub.s32 %s2227_s20, %s2329_s23  ;;  %p288_p0 = scmp.ne.s32.totalorder %s2223_s19, %s2219_s18 }
   0x9   : > { %p276_p1 = scmp.eq.s32.totalorder %s275_s25, 0  ;;  %p289_p2 = scmp.eq.s32.totalorder %s2325_s21, 1 }
   0xa   : > { %p294_p3 = scmp.ne.s32.totalorder %s2219_s18, %s2215_s17  ;;  %p295_p4 = scmp.eq.s32.totalorder %s1960_s22, 1 }
   0xb   : > { %s2340_s26 = scalar_select %p276_p1, %s2223_s19, %s278_s24  }
   0xc   : > { %p2342_p5 = por %p289_p2, %p288_p0  ;;  %p2346_p6 = por %p295_p4, %p294_p3 }
   0xd   : > { %p1963_p7 = scmp.ge.s32.totalorder %s2227_s20, 1  ;;  %p351_p8 = scmp.lt.s32.totalorder %s2227_s20, 3 }
   0xf   : > { %p352_p9 = pnand %p1963_p7, %p351_p8 }
  0x10   : > { %p398_p10 = scmp.lt.s32.totalorder (!%p352_p9), %s2325_s21, 1  ;;  %s2949_s0 = sld [smem:[#allocation5_spill]] (!%p352_p9) }
  0x11   : > { %355 = sbr.rel (%p352_p9) target bundleno = 613 (0x265), region = 60  ;;  %s2230_s15 = smov (!%p352_p9), 127  }
  0x12   : > { %s2231_s25 = smov (!%p352_p9), 112   ;;  %s2233_s12 = smov (!%p352_p9), 95  }
  0x13   : > { %s2234_s13 = smov (!%p352_p9), 126   ;;  %s2237_s16 = smov (!%p352_p9), 94  }
  0x14   : > { %s2954_s1 = sld [smem:[#allocation6_spill]] (!%p352_p9) }
  0x16   : > { %v2229_v0 = vmov 0   ;;  %s2356_s29 = scalar_select %p398_p10, %s2325_s21, 1  ;;  %v1381_v28 = vld [vmem:[%s2935_s2] sm:$0xff]  ;;  %v1384_v29 = vld [vmem:[%s2935_s2 + $0x18] sm:$0xff]  ;;  %v413_v31 = vlaneseq  ;;  %vm757_vm0 = vcmask 916480   ;;  %vm476_vm1 = vcmask 1039360  }
  0x17   : > { %2158 = vset.pattern.permute.xlu1 %v2229_v0  ;;  %2160 = vset.pattern.permute.xlu0 %v2229_v0  ;;  %v1422_v34 = vld [vmem:[%s2937_s4] sm:$0x1]  ;;  %vm492_vm2 = vcmask 1043456   ;;  %vm479_vm5 = vcmask 31744   ;;  %vm967_vm11 = vcmask 900096  }
  0x18   : > { %2159 = vset.pattern.permute.xlu2 %v2229_v0  ;;  %s2103_s30 = smul.u32 12, %s2356_s29  ;;  %s405_s24 = scalar_lea.vmem %s2936_s3, %s2356_s29  ;;  %v2378_v32 = vand.u32 127, %v413_v31 }
  0x19   : > { %v1421_v6 = vld [vmem:[%s405_s24] sm:$0x1] }
  0x1a   : > { %s402_s14 = scalar_lea.vmem %s2949_s0, %s2103_s30  ;;  %s2232_s30 = smov 110   ;;  %v2384_v37 = vadd.s32 128, %v2378_v32  ;;  %v420_v42 = vand.u32 15, %v2378_v32  ;;  %v2411_v56 = vld [vmem:[%s2954_s1 + $0x30] sm:$0xff]  ;;  %v1970_v57 = vld [vmem:[%s2954_s1 + $0x38] sm:$0xff]  ;;  %v1967_v61 = vld [vmem:[%s2954_s1 + $0x20] sm:$0xff] }
  0x1b   : > { %v412_v1 = vld [vmem:[%s402_s14 + $0x8] sm:$0xf]  ;;  %v411_v2 = vld [vmem:[%s402_s14] sm:$0xff]  ;;  %s2235_s14 = smov 111  }
  0x1c   : > { %466 = vst [vmem:[#allocation1 + $0x10] ss:$2 sm:$0xff] %v412_v1  ;;  %v427_v43 = vand.u32 15, %v2384_v37  ;;  %vm2395_vm3 = vcmp.ge.s32.totalorder %v420_v42, 1  ;;  %vm2497_vm13 = vcmp.le.s32.totalorder %v420_v42, 14 }
  0x1d   : > { %447 = vst [vmem:[#allocation1] ss:$2 sm:$0xff] %v411_v2 }
  0x1e   : > { %vm2401_vm4 = vcmp.ge.s32.totalorder %v427_v43, 1  ;;  %vm2490_vm12 = vcmp.le.s32.totalorder %v427_v43, 14 }
  0x23   : > { %v469_v3 = vld.sshfl [vmem:[#allocation1 + $0x10] sm:$0xff pattern:$0x75316420] }
  0x24   : > { %474 = vrot.lane.b32.xlu1 %v469_v3, %s2230_s15  ;;  %639 = vst [vmem:[#allocation1 + $0x10] ss:$2 sm:$0xff] %v412_v1  ;;  %v2363_v4 = vld.sshfl [vmem:[#allocation1] sm:$0xff pattern:$0x75316420] }
  0x25   : > { %v2365_v5 = vld.sshfl [vmem:[#allocation1 + $0x8] sm:$0xff pattern:$0x75316420]  ;;  %v452_v58 = vsel %vm2395_vm3, %v2363_v4, 0.0  ;;  %v2238_v4 = vmov 683565275  }
  0x26   : > { %464 = vst [vmem:[#allocation1] ss:$2 sm:$0xff] %v411_v2  ;;  %v453_v59 = vsel %vm2401_vm4, %v2365_v5, 0.0 }
  0x2b   : > { %v642_v7 = vld.sshfl [vmem:[#allocation1 + $0x10] sm:$0xff pattern:$0x75316420] }
  0x2c   : > { %1425 = vperm.xlu1 %2158, %v1421_v6   ;;  %747 = vst [vmem:[#allocation1 + $0x10] ss:$2 sm:$0xff] %v412_v1  ;;  %v2239_v6 = vmov 2475754826  }
  0x2d   : > { %v467_v8 = vld.sshfl [vmem:[#allocation1] sm:$0xff pattern:$0x75316420]  ;;  %v468_v9 = vld.sshfl [vmem:[#allocation1 + $0x8] sm:$0xff pattern:$0x75316420] }
  0x2e   : > { %470 = vrot.lane.b32.xlu0 %v467_v8, %s2230_s15  ;;  %637 = vst [vmem:[#allocation1] ss:$2 sm:$0xff] %v411_v2  ;;  %v2240_v8 = vmov 2131351028  }
  0x33   : > { %v750_v10 = vld.sshfl [vmem:[#allocation1 + $0x10] sm:$0xff pattern:$0x75316420] }
  0x34   : > { %860 = vst [vmem:[#allocation1 + $0x10] ss:$2 sm:$0xff] %v412_v1 }
  0x35   : > { %v640_v11 = vld.sshfl [vmem:[#allocation1] sm:$0xff pattern:$0x75316420]  ;;  %v641_v12 = vld.sshfl [vmem:[#allocation1 + $0x8] sm:$0xff pattern:$0x75316420] }
  0x36   : > { %472 = vrot.lane.b32.xlu0 %v468_v9, %s2230_s15  ;;  %745 = vst [vmem:[#allocation1] ss:$2 sm:$0xff] %v411_v2  ;;  %s2236_s15 = smov 96  }
  0x3b   : > { %v863_v13 = vld.sshfl [vmem:[#allocation1 + $0x10] sm:$0xff pattern:$0x75316420] }
  0x3c   : > { %957 = vst [vmem:[#allocation1 + $0x10] ss:$2 sm:$0xff] %v412_v1 }
  0x3d   : > { %v748_v14 = vld.sshfl [vmem:[#allocation1] sm:$0xff pattern:$0x75316420]  ;;  %v749_v15 = vld.sshfl [vmem:[#allocation1 + $0x8] sm:$0xff pattern:$0x75316420] }
  0x3e   : > { %755 = vrot.lane.b32.xlu0 %v750_v10, %s2231_s25  ;;  %751 = vrot.lane.b32.xlu2 %v748_v14, %s2231_s25  ;;  %858 = vst [vmem:[#allocation1] ss:$2 sm:$0xff] %v411_v2  ;;  %v2241_v10 = vmov 2102212464  }
  0x43   : > { %v960_v16 = vld.sshfl [vmem:[#allocation1 + $0x10] sm:$0xff pattern:$0x75316420] }
  0x44   : > { %1065 = vst [vmem:[#allocation1 + $0x10] ss:$2 sm:$0xff] %v412_v1 }
  0x45   : > { %v861_v17 = vld.sshfl [vmem:[#allocation1] sm:$0xff pattern:$0x75316420]  ;;  %v862_v18 = vld.sshfl [vmem:[#allocation1 + $0x8] sm:$0xff pattern:$0x75316420] }
  0x46   : > { %965 = vrot.lane.b32.xlu0 %v960_v16, %s2232_s30  ;;  %753 = vrot.lane.b32.xlu2 %v749_v15, %s2231_s25  ;;  %955 = vst [vmem:[#allocation1] ss:$2 sm:$0xff] %v411_v2  ;;  %s396_s25 = sand.u32 1, %s2219_s18  }
  0x47   : > { %s1856_s24 = scalar_lea.sflag [#allocation3], %s396_s25 }
  0x4b   : > { %v1068_v19 = vld.sshfl [vmem:[#allocation1 + $0x10] sm:$0xff pattern:$0x75316420] }
  0x4c   : > { %1178 = vst [vmem:[#allocation1 + $0x10] ss:$2 sm:$0xff] %v412_v1 }
  0x4d   : > { %v958_v20 = vld.sshfl [vmem:[#allocation1] sm:$0xff pattern:$0x75316420]  ;;  %v959_v21 = vld.sshfl [vmem:[#allocation1 + $0x8] sm:$0xff pattern:$0x75316420] }
  0x4e   : > { %961 = vrot.lane.b32.xlu1 %v958_v20, %s2232_s30  ;;  %1063 = vst [vmem:[#allocation1] ss:$2 sm:$0xff] %v411_v2  ;;  %963 = vrot.lane.b32.xlu2 %v959_v21, %s2232_s30  ;;  %v2243_v21 = vmov 1326507024  }
  0x53   : > { %v1181_v22 = vld.sshfl [vmem:[#allocation1 + $0x10] sm:$0xff pattern:$0x75316420] }
  0x54   : > { %1275 = vst [vmem:[#allocation1 + $0x10] ss:$2 sm:$0xff] %v412_v1  ;;  %1186 = vrot.lane.b32.xlu0 %v1181_v22, %s2233_s12 }
  0x55   : > { %v1066_v23 = vld.sshfl [vmem:[#allocation1] sm:$0xff pattern:$0x75316420]  ;;  %v1067_v24 = vld.sshfl [vmem:[#allocation1 + $0x8] sm:$0xff pattern:$0x75316420] }
  0x56   : > { %1176 = vst [vmem:[#allocation1] ss:$2 sm:$0xff] %v411_v2 }
  0x5b   : > { %v1278_v38 = vld.sshfl [vmem:[#allocation1 + $0x10] sm:$0xff pattern:$0x75316420] }
  0x5c   : > { %647 = vrot.lane.b32.xlu0 %v642_v7, %s2234_s13 }
  0x5d   : > { %v1179_v25 = vld.sshfl [vmem:[#allocation1] sm:$0xff pattern:$0x75316420]  ;;  %v1180_v26 = vld.sshfl [vmem:[#allocation1 + $0x8] sm:$0xff pattern:$0x75316420] }
  0x5e   : > { %1182 = vrot.lane.b32.xlu1 %v1179_v25, %s2233_s12  ;;  %1184 = vrot.lane.b32.xlu2 %v1180_v26, %s2233_s12  ;;  %1273 = vst [vmem:[#allocation1] ss:$2 sm:$0xff] %v411_v2  ;;  %s2100_s12 = sshll.u32 %s2356_s29, 6 }
  0x5f   : > { %s2832_s22 = scalar_lea.vmem %s2943_s10, %s2100_s12  ;;  %s2185_s12 = scalar_lea.hbm %s2944_s11, 2 }
  0x64   : > { %868 = vrot.lane.b32.xlu0 %v863_v13, %s2235_s14 }
  0x65   : > { %v1276_v27 = vld.sshfl [vmem:[#allocation1] sm:$0xff pattern:$0x75316420] }
  0x66   : > { %643 = vrot.lane.b32.xlu1 %v640_v11, %s2234_s13  ;;  %645 = vrot.lane.b32.xlu2 %v641_v12, %s2234_s13  ;;  %v2242_v12 = vmov 920167782  }
  0x6c   : > { %1073 = vrot.lane.b32.xlu0 %v1068_v19, %s2236_s15  ;;  %v454_v19 = vld [vmem:[%s2954_s1] sm:$0xff] }
  0x6e   : > { %864 = vrot.lane.b32.xlu1 %v861_v17, %s2235_s14  ;;  %866 = vrot.lane.b32.xlu2 %v862_v18, %s2235_s14 }
  0x74   : > { %1283 = vrot.lane.b32.xlu0 %v1278_v38, %s2237_s16 }
  0x76   : > { %1069 = vrot.lane.b32.xlu1 %v1066_v23, %s2236_s15  ;;  %1071 = vrot.lane.b32.xlu2 %v1067_v24, %s2236_s15  ;;  %s397_s15 = scalar_lea.vmem [#allocation2], %s396_s25 }
  0x7e   : > { %1279 = vrot.lane.b32.xlu1 %v1276_v27, %s2237_s16  ;;  %v1968_v27 = vld [vmem:[%s2954_s1 + $0x28] sm:$0xff] }
  0x86   : > { %1387 = vperm.xlu1 %2158, %v1381_v28  }
  0x8e   : > { %1402 = vperm.xlu1 %2158, %v1384_v29  }
  0x96   : > { %v475_v30 = vpop.permute.xlu1 %474 }
  0x98   : > { %v752_v33 = vpop.permute.xlu2 %751 }
  0x9e   : > { %v1426_v35 = vpop.permute.xlu1 %1425 }
  0x9f   : > { %v1428_v36 = vperm.slane %v1426_v35, 0 }
  0xa0   : > { %v471_v39 = vpop.permute.xlu0 %470  ;;  %v754_v48 = vpop.permute.xlu2 %753 }
  0xa1   : > { %v2387_v40 = vmul.f32 %v1428_v36, %v1422_v34  ;;  %v758_v51 = vsel %vm757_vm0, %v752_v33, %v754_v48  ;;  %v1277_v34 = vld.sshfl [vmem:[#allocation1 + $0x8] sm:$0xff pattern:$0x75316420] }
  0xa2   : > { %v762_v60 = vsel %vm2395_vm3, %v758_v51, 0.0  ;;  %1281 = vrot.lane.b32.xlu2 %v1277_v34, %s2237_s16  ;;  %s1869_s16 = sshll.u32 %s397_s15, 4  ;;  %s1870_s16 = int_to_ptr.vmem [resolvable:$true] %s1869_s16 }
  0xa3   : > { %v1433_v41 = vand.u32 2139095040, %v2387_v40  ;;  %v1430_v44 = vand.u32 2147483647, %v2387_v40 }
  0xa5   : > { %v1434_v45 = vshrl.u32 %v1433_v41, 23  ;;  %v1437_v52 = vand.u32 8388607, %v1430_v44 }
  0xa7   : > { %v2089_v46 = vadd.s32 4294967169, %v1434_v45  ;;  %v1438_v63 = vor.u32 8388608, %v1437_v52 }
  0xa8   : > { %v473_v50 = vpop.permute.xlu0 %472 }
  0xa9   : > { %v1440_v53 = vadd.s32 1, %v2089_v46  ;;  %v477_v54 = vsel %vm476_vm1, %v471_v39, %v473_v50  ;;  %v478_v55 = vsel %vm476_vm1, %v473_v50, %v475_v30  ;;  %v2441_v18 = vshll.u32 %v1438_v63, 8  ;;  %v964_v50 = vpop.permute.xlu2 %963 }
  0xaa   : > { %1971 = vmatpush.msk.msra.mxu0 %vm492_vm2, %v477_v54  ;;  %2101 = vmatpush.msk.msra.mxu2 %vm492_vm2, %v477_v54 }
  0xab   : > { %vm1441_vm6 = vcmp.gt.s32.totalorder %v1440_v53, 0  ;;  %1976 = vmatpush.msk.msra.mxu1 %vm492_vm2, %v478_v55  ;;  %2102 = vmatpush.msk.msra.mxu3 %vm492_vm2, %v478_v55  ;;  %v1479_v41 = vand.u32 65535, %v2441_v18  ;;  %v1480_v45 = vshrl.u32 %v2441_v18, 16 }
  0xac   : > { %v1442_v62 = vsel %vm1441_vm6, %v1440_v53, 0  ;;  %1974 = vmatmul.msk.f32.vlgmr.msra.gmra.mxu2 %vm479_vm5, %v2411_v56  ;;  %1980 = vmatmul.msk.f32.vlgmr.msra.gmra.mxu3 %vm479_vm5, %v1970_v57 }
  0xad   : > { %v1444_v1 = vand.u32 31, %v1442_v62  ;;  %1981 = vmatpush.msk.msrb.mxu2 %vm492_vm2, %v452_v58  ;;  %1986 = vmatpush.msk.msrb.mxu3 %vm492_vm2, %v453_v59  ;;  %v2436_v2 = vshrl.u32 %v1442_v62, 5  ;;  %v455_v58 = vld [vmem:[%s2954_s1 + $0x8] sm:$0xff] }
  0xae   : > { %1977 = vmatmul.msk.f32.vlgmr.msra.gmra.mxu1 %vm479_vm5, %v1967_v61  ;;  %1972 = vmatmul.msk.f32.vlgmr.msra.gmra.mxu0 %vm479_vm5, %v1967_v61 }
  0xaf   : > { %2009 = vmatpush.msk.msra.mxu2 %vm492_vm2, %v762_v60  ;;  %v1445_v3 = vsub.s32 32, %v1444_v1  ;;  %v1447_v5 = vshll.u32 %v2238_v4, %v1444_v1  ;;  %v1450_v7 = vshll.u32 %v2239_v6, %v1444_v1  ;;  %v1453_v9 = vshll.u32 %v2240_v8, %v1444_v1 }
  0xb0   : > { %v1456_v11 = vshll.u32 %v2241_v10, %v1444_v1  ;;  %v1459_v13 = vshll.u32 %v2242_v12, %v1444_v1  ;;  %v756_v14 = vpop.permute.xlu0 %755  ;;  %vm1462_vm7 = vcmp.lt.s32.totalorder %v2436_v2, 1  ;;  %vm1465_vm8 = vcmp.lt.s32.totalorder %v2436_v2, 4 }
  0xb1   : > { %v1448_v15 = vshrl.u32 %v2239_v6, %v1445_v3  ;;  %v1451_v16 = vshrl.u32 %v2240_v8, %v1445_v3  ;;  %v1454_v17 = vshrl.u32 %v2241_v10, %v1445_v3  ;;  %v1457_v20 = vshrl.u32 %v2242_v12, %v1445_v3 }
  0xb2   : > { %v1460_v22 = vshrl.u32 %v2243_v21, %v1445_v3  ;;  %v759_v26 = vsel %vm757_vm0, %v754_v48, %v756_v14  ;;  %vm1464_vm9 = vcmp.lt.s32.totalorder %v2436_v2, 3  ;;  %vm1463_vm10 = vcmp.lt.s32.totalorder %v2436_v2, 2 }
  0xb3   : > { %v1449_v23 = vor.u32 %v1448_v15, %v1447_v5  ;;  %v2448_v24 = vor.u32 %v1451_v16, %v1450_v7  ;;  %v1455_v25 = vor.u32 %v1454_v17, %v1453_v9  ;;  %v1458_v28 = vor.u32 %v1457_v20, %v1456_v11 }
  0xb4   : > { %v1461_v29 = vor.u32 %v1460_v22, %v1459_v13  ;;  %1975 = vmatmul.msk.f32.gmra.mxu2 %vm479_vm5, %v1970_v57  ;;  %1987 = vmatmul.msk.f32.vlgmr.msrb.gmra.mxu3 %vm479_vm5, %v454_v19  ;;  %v763_v30 = vsel %vm2401_vm4, %v759_v26, 0.0  ;;  %v1446_v57 = vshrl.u32 %v2238_v4, %v1445_v3  ;;  %v2048_v3 = vld [vmem:[%s2954_s1 + $0xc8] sm:$0xff] }
  0xb5   : > { %v1470_v31 = vsel %vm1462_vm7, %v1449_v23, %v2448_v24  ;;  %v1474_v33 = vsel %vm1462_vm7, %v2448_v24, %v1455_v25  ;;  %2014 = vmatpush.msk.msra.mxu3 %vm492_vm2, %v763_v30  ;;  %v1471_v35 = vsel %vm1465_vm8, %v1458_v28, 920167782  ;;  %v1467_v9 = vsel %vm1465_vm8, %v1455_v25, 2102212464 }
  0xb6   : > { %v1475_v36 = vsel %vm1465_vm8, %v1461_v29, 1326507024  ;;  %1978 = vmatmul.msk.f32.gmra.mxu1 %vm479_vm5, %v1968_v27  ;;  %v1472_v38 = vsel %vm1464_vm9, %v1455_v25, %v1471_v35  ;;  %1973 = vmatmul.msk.f32.gmra.mxu0 %vm479_vm5, %v1968_v27  ;;  %v1466_v43 = vsel %vm1462_vm7, %v1446_v57, %v1449_v23  ;;  %v1468_v26 = vsel %vm1464_vm9, %v2448_v24, %v1467_v9  ;;  %v2005_v57 = vld [vmem:[%s2954_s1 + $0x60] sm:$0xff]  ;;  %v2006_v9 = vld [vmem:[%s2954_s1 + $0x68] sm:$0xff] }
  0xb7   : > { %v1476_v39 = vsel %vm1464_vm9, %v1458_v28, %v1475_v36  ;;  %v1473_v46 = vsel %vm1463_vm10, %v1470_v31, %v1472_v38  ;;  %v1469_v35 = vsel %vm1463_vm10, %v1466_v43, %v1468_v26  ;;  %vm649_vm7 = vcmask 1031168  }
  0xb8   : > { %v1477_v48 = vsel %vm1463_vm10, %v1474_v33, %v1476_v39  ;;  %v1503_v53 = vand.u32 65535, %v1473_v46  ;;  %v1504_v54 = vshrl.u32 %v1473_v46, 16  ;;  %v966_v55 = vpop.permute.xlu0 %965  ;;  %v1185_v22 = vpop.permute.xlu2 %1184  ;;  %vm1188_vm8 = vcmask 777216  }
  0xb9   : > { %v1481_v51 = vand.u32 65535, %v1477_v48  ;;  %v1482_v52 = vshrl.u32 %v1477_v48, 16  ;;  %v969_v59 = vsel %vm967_vm11, %v964_v50, %v966_v55  ;;  %vm870_vm9 = vcmask 908288  }
  0xba   : > { %v1505_v1 = vmul.u32 %v1503_v53, %v1479_v41  ;;  %v1506_v5 = vmul.u32 %v1504_v54, %v1479_v41  ;;  %v1507_v6 = vmul.u32 %v1503_v53, %v1480_v45  ;;  %v973_v37 = vsel %vm2490_vm12, %v969_v59, 0.0 }
  0xbb   : > { %v1483_v60 = vmul.u32 %v1481_v51, %v1479_v41  ;;  %v1484_v61 = vmul.u32 %v1482_v52, %v1479_v41  ;;  %v1485_v62 = vmul.u32 %v1481_v51, %v1480_v45  ;;  %v1486_v4 = vmul.u32 %v1482_v52, %v1480_v45  ;;  %2042 = vmatpush.msk.msrb.mxu3 %vm492_vm2, %v973_v37 }
  0xbc   : > { %1982 = vmatmul.msk.f32.vlgmr.msrb.gmra.mxu2 %vm479_vm5, %v454_v19  ;;  %1988 = vmatmul.msk.f32.gmra.mxu3 %vm479_vm5, %v455_v58  ;;  %v1508_v10 = vmul.u32 %v1504_v54, %v1480_v45  ;;  %v1509_v32 = vshll.u32 %v1506_v5, 16  ;;  %v1511_v12 = vshll.u32 %v1507_v6, 16  ;;  %v1510_v15 = vshrl.u32 %v1506_v5, 16 }
  0xbd   : > { %v1487_v7 = vshll.u32 %v1484_v61, 16  ;;  %v1489_v8 = vshll.u32 %v1485_v62, 16  ;;  %v1488_v11 = vshrl.u32 %v1484_v61, 16  ;;  %v1490_v27 = vshrl.u32 %v1485_v62, 16 }
  0xbe   : > { %1979 = vmatmul.msk.f32.gmra.mxu1 %vm479_vm5, %v2411_v56  ;;  %vm1513_vm15 = vc.u32 %v1505_v1, %v1509_v32  ;;  %v1515_v16 = vadd.s32 %v1509_v32, %v1505_v1  ;;  %v456_v56 = vld [vmem:[%s2954_s1 + $0x10] sm:$0xff]  ;;  %v1512_v30 = vshrl.u32 %v1507_v6, 16  ;;  %v1523_v41 = vmul.u32 %v2441_v18, %v1469_v35  ;;  %v1991_v18 = vld [vmem:[%s2954_s1 + $0x40] sm:$0xff]  ;;  %v1992_v1 = vld [vmem:[%s2954_s1 + $0x48] sm:$0xff] }
  0xbf   : > { %vm1491_vm14 = vc.u32 %v1483_v60, %v1487_v7  ;;  %v1493_v42 = vadd.s32 %v1487_v7, %v1483_v60  ;;  %v1514_v20 = vsel %vm1513_vm15, 1, %v2229_v0  ;;  %v2020_v35 = vld [vmem:[%s2954_s1 + $0x88] sm:$0xff]  ;;  %vm1285_vm15 = vcmask 769024  }
  0xc0   : > { %v1492_v13 = vsel %vm1491_vm14, 1, %v2229_v0  ;;  %v962_v14 = vpop.permute.xlu1 %961  ;;  %v1516_v25 = vadd.s32 %v1514_v20, %v1508_v10  ;;  %vm1517_vm1 = vc.u32 %v1515_v16, %v1511_v12  ;;  %v2527_v34 = vadd.s32 %v1515_v16, %v1511_v12  ;;  %v646_v2 = vpop.permute.xlu2 %645 }
  0xc1   : > { %v1494_v17 = vadd.s32 %v1492_v13, %v1486_v4  ;;  %v968_v19 = vsel %vm967_vm11, %v962_v14, %v964_v50  ;;  %vm1495_vm0 = vc.u32 %v1493_v42, %v1489_v8  ;;  %v1518_v29 = vsel %vm1517_vm1, 1, %v2229_v0  ;;  %v1993_v42 = vld [vmem:[%s2954_s1 + $0x50] sm:$0xff] }
  0xc2   : > { %v972_v21 = vsel %vm2497_vm13, %v968_v19, 0.0  ;;  %v1496_v23 = vsel %vm1495_vm0, 1, %v2229_v0  ;;  %v1520_v31 = vadd.s32 %v1518_v29, %v1516_v25  ;;  %v457_v0 = vld [vmem:[%s2954_s1 + $0x18] sm:$0xff]  ;;  %v2007_v13 = vld [vmem:[%s2954_s1 + $0x70] sm:$0xff]  ;;  %vm1075_vm14 = vcmask 785408  }
  0xc3   : > { %2037 = vmatpush.msk.msrb.mxu2 %vm492_vm2, %v972_v21  ;;  %v1498_v28 = vadd.s32 %v1496_v23, %v1494_v17  ;;  %v2008_v17 = vld [vmem:[%s2954_s1 + $0x78] sm:$0xff]  ;;  %vm1743_vm0 = vcmask 130048   ;;  %vm1573_vm1 = vweird.f32 %v2387_v40 }
  0xc4   : > { %1983 = vmatmul.msk.f32.gmra.mxu2 %vm479_vm5, %v455_v58  ;;  %1989 = vmatmul.msk.f32.gmra.mxu3 %vm479_vm5, %v456_v56  ;;  %v1521_v24 = vadd.s32 %v1520_v31, %v1510_v15  ;;  %v1994_v15 = vld [vmem:[%s2954_s1 + $0x58] sm:$0xff] }
  0xc5   : > { %v1499_v33 = vadd.s32 %v1498_v28, %v1488_v11 }
  0xc6   : > { %v1187_v36 = vpop.permute.xlu0 %1186  ;;  %v1522_v39 = vadd.s32 %v1521_v24, %v1512_v30 }
  0xc7   : > { %v2531_v38 = vadd.s32 %v1499_v33, %v1490_v27  ;;  %v1190_v58 = vsel %vm1188_vm8, %v1185_v22, %v1187_v36  ;;  %v2019_v27 = vld [vmem:[%s2954_s1 + $0x80] sm:$0xff] }
  0xc8   : > { %v1526_v45 = vadd.s32 1, %v1522_v39  ;;  %v867_v60 = vpop.permute.xlu2 %866 }
  0xc9   : > { %vm1525_vm6 = vc.u32 %v2531_v38, %v2527_v34  ;;  %v1524_v20 = vadd.s32 %v2527_v34, %v2531_v38  ;;  %v2033_v34 = vld [vmem:[%s2954_s1 + $0xa0] sm:$0xff]  ;;  %v2034_v38 = vld [vmem:[%s2954_s1 + $0xa8] sm:$0xff] }
  0xca   : > { %v1527_v46 = vsel %vm1525_vm6, %v1526_v45, %v1522_v39  ;;  %v2021_v45 = vld [vmem:[%s2954_s1 + $0x90] sm:$0xff] }
  0xcb   : > { %v1528_v48 = vadd.s32 %v1527_v46, %v1523_v41  ;;  %v1742_v41 = vld [vmem:[%s2939_s6 + $0x8] sm:$0xff]  ;;  %v2035_v46 = vld [vmem:[%s2954_s1 + $0xb0] sm:$0xff] }
  0xcc   : > { %1984 = vmatmul.msk.f32.gmra.mxu2 %vm479_vm5, %v456_v56  ;;  %1990 = vmatmul.msk.f32.gmra.mxu3 %vm479_vm5, %v457_v0 }
  0xcd   : > { %v1529_v52 = vadd.s32 536870912, %v1528_v48 }
  0xce   : > { %v648_v50 = vpop.permute.xlu0 %647 }
  0xcf   : > { %v651_v51 = vsel %vm649_vm7, %v646_v2, %v648_v50  ;;  %v2548_v55 = vshrl.u32 %v1529_v52, 30  ;;  %v2036_v52 = vld [vmem:[%s2954_s1 + $0xb8] sm:$0xff]  ;;  %v2077_v50 = vld [vmem:[%s2954_s1 + $0x110] sm:$0xff] }
  0xd0   : > { %v1183_v53 = vpop.permute.xlu1 %1182  ;;  %v655_v54 = vsel %vm2490_vm12, %v651_v51, 0.0  ;;  %v1072_v23 = vpop.permute.xlu2 %1071  ;;  %v2022_v51 = vld [vmem:[%s2954_s1 + $0x98] sm:$0xff] }
  0xd1   : > { %2000 = vmatpush.msk.msrb.mxu1 %vm492_vm2, %v655_v54  ;;  %v1531_v59 = vshll.u32 %v2548_v55, 30  ;;  %v1189_v37 = vsel %vm1188_vm8, %v1183_v53, %v1185_v22  ;;  %v1584_v54 = vld [vmem:[%s2938_s5] sm:$0xff] }
  0xd2   : > { %2001 = vmatmul.msk.f32.vlgmr.msrb.gmra.mxu1 %vm479_vm5, %v1991_v18 }
  0xd3   : > { %v1532_v61 = vsub.s32 %v1528_v48, %v1531_v59 }
  0xd4   : > { %1985 = vmatmul.msk.f32.gmra.mxu2 %vm479_vm5, %v457_v0  ;;  %2015 = vmatmul.msk.f32.vlgmr.msra.gmra.mxu3 %vm479_vm5, %v2005_v57  ;;  %v1585_v0 = vld [vmem:[%s2938_s5 + $0x8] sm:$0xff] }
  0xd5   : > { %2070 = vmatpush.msk.msra.mxu3 %vm492_vm2, %v1190_v58  ;;  %vm1533_vm10 = vcmp.lt.s32.totalorder %v1532_v61, 0  ;;  %v1534_v6 = vsub.s32 0, %v1532_v61  ;;  %v2047_v58 = vld [vmem:[%s2954_s1 + $0xc0] sm:$0xff] }
  0xd6   : > { %v869_v62 = vpop.permute.xlu0 %868 }
  0xd7   : > { %v872_v5 = vsel %vm870_vm9, %v867_v60, %v869_v62  ;;  %v1535_v8 = vsel %vm1533_vm10, %v1534_v6, %v1532_v61  ;;  %v2061_v62 = vld [vmem:[%s2954_s1 + $0xe0] sm:$0xff] }
  0xd8   : > { %v644_v4 = vpop.permute.xlu1 %643  ;;  %2028 = vmatpush.msk.msra.mxu1 %vm492_vm2, %v872_v5  ;;  %v1536_v10 = vclz %v1535_v8 }
  0xd9   : > { %v650_v7 = vsel %vm649_vm7, %v644_v4, %v646_v2 }
  0xda   : > { %v654_v43 = vsel %vm2497_vm13, %v650_v7, 0.0  ;;  %2002 = vmatmul.msk.f32.gmra.mxu1 %vm479_vm5, %v1992_v1  ;;  %v2090_v32 = vadd.s32 4294967294, %v1536_v10 }
  0xdb   : > { %1995 = vmatpush.msk.msrb.mxu0 %vm492_vm2, %v654_v43 }
  0xdc   : > { %2010 = vmatmul.msk.f32.vlgmr.msra.gmra.mxu2 %vm479_vm5, %v2005_v57  ;;  %1996 = vmatmul.msk.f32.vlgmr.msrb.gmra.mxu0 %vm479_vm5, %v1991_v18  ;;  %vm2091_vm11 = vcmp.lt.s32.totalorder %v2090_v32, 0 }
  0xdd   : > { %2016 = vmatmul.msk.f32.gmra.mxu3 %vm479_vm5, %v2006_v9  ;;  %2065 = vmatpush.msk.msra.mxu2 %vm492_vm2, %v1189_v37  ;;  %v1539_v14 = vsel %vm2091_vm11, 0, %v2090_v32 }
  0xde   : > { %v1544_v16 = vsub.s32 4294967266, %v1539_v14  ;;  %v1540_v56 = vsub.s32 32, %v1539_v14  ;;  %v1074_v22 = vpop.permute.xlu0 %1073  ;;  %v1541_v30 = vshll.u32 %v1532_v61, %v1539_v14 }
  0xdf   : > { %v1077_v26 = vsel %vm1075_vm14, %v1072_v23, %v1074_v22 }
  0xe0   : > { %v865_v11 = vpop.permute.xlu1 %864  ;;  %v1545_v21 = vadd.s32 127, %v1544_v16  ;;  %v1081_v29 = vsel %vm2401_vm4, %v1077_v26, 0.0  ;;  %v1542_v31 = vshrl.u32 %v1524_v20, %v1540_v56  ;;  %vm2648_vm4 = vcmp.le.f32.partialorder %v1430_v44, 0.7853982  ;;  %v1741_v44 = vld [vmem:[%s2939_s6] sm:$0xff]  ;;  %v2050_v20 = vld [vmem:[%s2954_s1 + $0xd8] sm:$0xff] }
  0xe1   : > { %v871_v12 = vsel %vm870_vm9, %v865_v11, %v867_v60  ;;  %2056 = vmatpush.msk.msrb.mxu1 %vm492_vm2, %v1081_v29  ;;  %v1554_v11 = vsub.s32 4, %v2548_v55  ;;  %v2075_v29 = vld [vmem:[%s2954_s1 + $0x100] sm:$0xff] }
  0xe2   : > { %2003 = vmatmul.msk.f32.gmra.mxu1 %vm479_vm5, %v1993_v42  ;;  %2023 = vmatpush.msk.msra.mxu0 %vm492_vm2, %v871_v12  ;;  %v1546_v33 = vshll.u32 %v1545_v21, 23  ;;  %v1543_v47 = vor.u32 %v1542_v31, %v1541_v30 }
  0xe4   : > { %2011 = vmatmul.msk.f32.gmra.mxu2 %vm479_vm5, %v2006_v9  ;;  %1997 = vmatmul.msk.f32.gmra.mxu0 %vm479_vm5, %v1992_v1  ;;  %v1547_v49 = vor.u32 4788187, %v1546_v33  ;;  %v1550_v24 = vcvt.s32.f32 %v1543_v47  ;;  %v2062_v9 = vld [vmem:[%s2954_s1 + $0xe8] sm:$0xff]  ;;  %v1383_v47 = vld [vmem:[%s2935_s2 + $0x10] sm:$0xff] }
  0xe5   : > { %2017 = vmatmul.msk.f32.gmra.mxu3 %vm479_vm5, %v2007_v13  ;;  %1397 = vperm.xlu0 %2160, %v1383_v47  }
  0xe6   : > { %v1548_v36 = vand.u32 2147483647, %v1547_v49  ;;  %v1284_v1 = vpop.permute.xlu0 %1283 }
  0xe8   : > { %v1070_v19 = vpop.permute.xlu1 %1069  ;;  %v1551_v39 = vmul.f32 %v1550_v24, %v1548_v36 }
  0xe9   : > { %v1076_v25 = vsel %vm1075_vm14, %v1070_v19, %v1072_v23 }
  0xea   : > { %2004 = vmatmul.msk.f32.gmra.mxu1 %vm479_vm5, %v1994_v15  ;;  %v1080_v28 = vsel %vm2395_vm3, %v1076_v25, 0.0  ;;  %v1552_v2 = vxor.u32 2147483648, %v1551_v39  ;;  %vm1432_vm3 = vcmp.lt.s32.totalorder %v2387_v40, 0 }
  0xeb   : > { %2051 = vmatpush.msk.msrb.mxu0 %vm492_vm2, %v1080_v28 }
  0xec   : > { %2012 = vmatmul.msk.f32.gmra.mxu2 %vm479_vm5, %v2007_v13  ;;  %1998 = vmatmul.msk.f32.gmra.mxu0 %vm479_vm5, %v1993_v42  ;;  %v1553_v48 = vsel %vm1432_vm3, %v1552_v2, %v1551_v39  ;;  %v2049_v42 = vld [vmem:[%s2954_s1 + $0xd0] sm:$0xff]  ;;  %v2076_v39 = vld [vmem:[%s2954_s1 + $0x108] sm:$0xff] }
  0xed   : > { %2018 = vmatmul.msk.f32.gmra.mxu3 %vm479_vm5, %v2008_v17  ;;  %v1556_v18 = vsel %vm2648_vm4, %v2387_v40, %v1553_v48  ;;  %v2063_v13 = vld [vmem:[%s2954_s1 + $0xf0] sm:$0xff]  ;;  %v1382_v40 = vld [vmem:[%s2935_s2 + $0x8] sm:$0xff] }
  0xee   : > { %v1558_v53 = vmul.f32 %v1556_v18, %v1556_v18  ;;  %1392 = vperm.xlu2 %2159, %v1382_v40  }
  0xf0   : > { %v1566_v57 = vmul.f32 -0.00019511016, %v1558_v53  ;;  %v1280_v59 = vpop.permute.xlu1 %1279  ;;  %v1559_v8 = vmul.f32 -0.001358992, %v1558_v53 }
  0xf2   : > { %2029 = vmatmul.msk.f32.vlgmr.msra.gmra.mxu1 %vm479_vm5, %v2019_v27  ;;  %v1567_v6 = vadd.f32 0.008332121, %v1566_v57  ;;  %v1560_v43 = vadd.f32 0.041655596, %v1559_v8  ;;  %v2078_v57 = vld [vmem:[%s2954_s1 + $0x118] sm:$0xff] }
  0xf4   : > { %2013 = vmatmul.msk.f32.gmra.mxu2 %vm479_vm5, %v2008_v17  ;;  %1999 = vmatmul.msk.f32.gmra.mxu0 %vm479_vm5, %v1994_v15  ;;  %v1568_v37 = vmul.f32 %v1567_v6, %v1558_v53  ;;  %v1561_v63 = vmul.f32 %v1560_v43, %v1558_v53  ;;  %v1555_v15 = vsel %vm1432_vm3, %v1554_v11, %v2548_v55  ;;  %v2064_v55 = vld [vmem:[%s2954_s1 + $0xf8] sm:$0xff] }
  0xf5   : > { %2043 = vmatmul.msk.f32.vlgmr.msrb.gmra.mxu3 %vm479_vm5, %v2033_v34  ;;  %v1557_v17 = vsel %vm2648_vm4, 0, %v1555_v15 }
  0xf6   : > { %1784 = vmatpush.msrb.mxu3 %v1585_v0  ;;  %v1569_v10 = vadd.f32 -0.16666654, %v1568_v37  ;;  %v1562_v12 = vadd.f32 -0.4999988, %v1561_v63  ;;  %v1574_v21 = vand.u32 3, %v1557_v17  ;;  %v1730_v25 = vadd.s32 3, %v1557_v17 }
  0xf8   : > { %1785 = vmatpush.msrb.mxu3 %v1584_v54  ;;  %v1570_v32 = vmul.f32 %v1569_v10, %v1558_v53  ;;  %v1563_v16 = vmul.f32 %v1562_v12, %v1558_v53  ;;  %v1731_v31 = vand.u32 3, %v1730_v25 }
  0xfa   : > { %2030 = vmatmul.msk.f32.gmra.mxu1 %vm479_vm5, %v2020_v35  ;;  %v1571_v14 = vadd.f32 1.0, %v1570_v32  ;;  %v1564_v56 = vadd.f32 1.0, %v1563_v16  ;;  %vm1733_vm6 = vcmp.eq.s32.totalorder %v1731_v31, 0  ;;  %vm1736_vm7 = vcmp.eq.s32.totalorder %v1731_v31, 2 }
  0xfb   : > { %vm1732_vm8 = vcmp.lt.s32.totalorder %v1731_v31, 2 }
  0xfc   : > { %2038 = vmatmul.msk.f32.vlgmr.msrb.gmra.mxu2 %vm479_vm5, %v2033_v34  ;;  %2024 = vmatmul.msk.f32.vlgmr.msra.gmra.mxu0 %vm479_vm5, %v2019_v27  ;;  %v1282_v60 = vpop.permute.xlu2 %1281  ;;  %v1572_v19 = vmul.f32 %v1571_v14, %v1556_v18  ;;  %v1580_v23 = vxor.u32 2147483648, %v1564_v56 }
  0xfd   : > { %2044 = vmatmul.msk.f32.gmra.mxu3 %vm479_vm5, %v2034_v38  ;;  %1761 = vmatpush.msrb.mxu2 %v1742_v41  ;;  %v1286_v61 = vsel %vm1285_vm15, %v1280_v59, %v1282_v60  ;;  %v1287_v4 = vsel %vm1285_vm15, %v1282_v60, %v1284_v1 }
  0xfe   : > { %v1290_v5 = vsel %vm2497_vm13, %v1286_v61, 0.0  ;;  %v1291_v7 = vsel %vm2490_vm12, %v1287_v4, 0.0  ;;  %v1577_v22 = vxor.u32 2147483648, %v1572_v19  ;;  %vm1579_vm12 = vcmp.eq.s32.totalorder %v1574_v21, 2 }
  0xff   : > { %1762 = vmatpush.msrb.mxu2 %v1741_v44  ;;  %2079 = vmatpush.msk.msra.mxu0 %vm492_vm2, %v1290_v5  ;;  %vm1575_vm13 = vcmp.lt.s32.totalorder %v1574_v21, 2  ;;  %v1581_v30 = vsel %vm1579_vm12, %v1580_v23, %v1572_v19 }
 0x100   : > { %2084 = vmatpush.msk.msra.mxu1 %vm492_vm2, %v1291_v7  ;;  %vm1576_vm2 = vcmp.eq.s32.totalorder %v1574_v21, 0 }
 0x101   : > { %v1578_v26 = vsel %vm1576_vm2, %v1564_v56, %v1577_v22 }
 0x102   : > { %2031 = vmatmul.msk.f32.gmra.mxu1 %vm479_vm5, %v2021_v45  ;;  %v1582_v33 = vsel %vm1575_vm13, %v1578_v26, %v1581_v30 }
 0x103   : > { %v1583_v49 = vsel %vm1573_vm1, nan, %v1582_v33 }
 0x104   : > { %2039 = vmatmul.msk.f32.gmra.mxu2 %vm479_vm5, %v2034_v38  ;;  %2025 = vmatmul.msk.f32.gmra.mxu0 %vm479_vm5, %v2020_v35  ;;  %v1735_v35 = vsel %vm1733_vm6, %v1564_v56, %v1577_v22  ;;  %v1738_v38 = vsel %vm1736_vm7, %v1580_v23, %v1572_v19 }
 0x105   : > { %2045 = vmatmul.msk.f32.gmra.mxu3 %vm479_vm5, %v2035_v46  ;;  %v1739_v0 = vsel %vm1732_vm8, %v1735_v35, %v1738_v38 }
 0x10a   : > { %2032 = vmatmul.msk.f32.gmra.mxu1 %vm479_vm5, %v2022_v51 }
 0x10c   : > { %2040 = vmatmul.msk.f32.gmra.mxu2 %vm479_vm5, %v2035_v46  ;;  %2026 = vmatmul.msk.f32.gmra.mxu0 %vm479_vm5, %v2021_v45  ;;  %v1740_v45 = vsel %vm1573_vm1, nan, %v1739_v0 }
 0x10d   : > { %2046 = vmatmul.msk.f32.gmra.mxu3 %vm479_vm5, %v2036_v52 }
 0x112   : > { %2057 = vmatmul.msk.f32.vlgmr.msrb.gmra.mxu1 %vm479_vm5, %v2047_v58 }
 0x114   : > { %2041 = vmatmul.msk.f32.gmra.mxu2 %vm479_vm5, %v2036_v52  ;;  %2027 = vmatmul.msk.f32.gmra.mxu0 %vm479_vm5, %v2022_v51 }
 0x115   : > { %2071 = vmatmul.msk.f32.vlgmr.msra.gmra.mxu3 %vm479_vm5, %v2061_v62 }
 0x11a   : > { %2058 = vmatmul.msk.f32.gmra.mxu1 %vm479_vm5, %v2048_v3 }
 0x11c   : > { %2066 = vmatmul.msk.f32.vlgmr.msra.gmra.mxu2 %vm479_vm5, %v2061_v62  ;;  %2052 = vmatmul.msk.f32.vlgmr.msrb.gmra.mxu0 %vm479_vm5, %v2047_v58 }
 0x11d   : > { %2072 = vmatmul.msk.f32.gmra.mxu3 %vm479_vm5, %v2062_v9 }
 0x122   : > { %2059 = vmatmul.msk.f32.gmra.mxu1 %vm479_vm5, %v2049_v42 }
 0x124   : > { %2067 = vmatmul.msk.f32.gmra.mxu2 %vm479_vm5, %v2062_v9  ;;  %2053 = vmatmul.msk.f32.gmra.mxu0 %vm479_vm5, %v2048_v3 }
 0x125   : > { %2073 = vmatmul.msk.f32.gmra.mxu3 %vm479_vm5, %v2063_v13 }
 0x12a   : > { %2060 = vmatmul.msk.f32.gmra.mxu1 %vm479_vm5, %v2050_v20 }
 0x12b   : > { %v543_v34 = vpop.f32.mrf.mxu1  ;;  %v514_v2 = vpop.f32.mrf.mxu0 }
 0x12c   : > { %2068 = vmatmul.msk.f32.gmra.mxu2 %vm479_vm5, %v2063_v13  ;;  %2054 = vmatmul.msk.f32.gmra.mxu0 %vm479_vm5, %v2049_v42 }
 0x12d   : > { %2074 = vmatmul.msk.f32.gmra.mxu3 %vm479_vm5, %v2064_v55 }
 0x12f   : > { %v520_v27 = vpop.f32.mrf.mxu2  ;;  %v552_v28 = vpop.f32.mrf.mxu3 }
 0x132   : > { %2085 = vmatmul.msk.f32.vlgmr.msra.gmra.mxu1 %vm479_vm5, %v2075_v29 }
 0x133   : > { %v546_v46 = vpop.f32.mrf.mxu1  ;;  %v517_v53 = vpop.f32.mrf.mxu0 }
 0x134   : > { %2069 = vmatmul.msk.f32.gmra.mxu2 %vm479_vm5, %v2064_v55  ;;  %2055 = vmatmul.msk.f32.gmra.mxu0 %vm479_vm5, %v2050_v20 }
 0x135   : > { %2096 = vmatmul.msk.f32.vlgmr.msrb.gmra.mxu3 %vm1743_vm0, %v1583_v49 }
 0x137   : > { %v523_v36 = vpop.f32.mrf.mxu2  ;;  %v619_v24 = vpop.f32.mrf.mxu3 }
 0x138   : > { %v620_v41 = vadd.f32 %v619_v24, %v543_v34 }
 0x13a   : > { %2086 = vmatmul.msk.f32.gmra.mxu1 %vm479_vm5, %v2076_v39 }
 0x13b   : > { %v549_v44 = vpop.f32.mrf.mxu1 }
 0x13c   : > { %2095 = vmatmul.msk.f32.vlgmr.msrb.gmra.mxu2 %vm1743_vm0, %v1740_v45  ;;  %2080 = vmatmul.msk.f32.vlgmr.msra.gmra.mxu0 %vm479_vm5, %v2075_v29 }
 0x13f   : > { %v590_v48 = vpop.f32.mrf.mxu2  ;;  %v622_v18 = vpop.f32.mrf.mxu3 }
 0x140   : > { %v591_v51 = vadd.f32 %v590_v48, %v514_v2  ;;  %v623_v52 = vadd.f32 %v622_v18, %v546_v46 }
 0x142   : > { %2087 = vmatmul.msk.f32.gmra.mxu1 %vm479_vm5, %v2077_v50 }
 0x144   : > { %2081 = vmatmul.msk.f32.gmra.mxu0 %vm479_vm5, %v2076_v39 }
 0x147   : > { %v593_v54 = vpop.f32.mrf.mxu2  ;;  %v625_v59 = vpop.f32.mrf.mxu3 }
 0x148   : > { %v594_v58 = vadd.f32 %v593_v54, %v517_v53  ;;  %v626_v60 = vadd.f32 %v625_v59, %v549_v44  ;;  %v1827_v59 = vld [vmem:[%s2941_s8 + $0x78] sm:$0xff] }
 0x149   : > { %1829 = vmatpush.msrb.mxu0 %v1827_v59 }
 0x14a   : > { %2088 = vmatmul.msk.f32.gmra.mxu1 %vm479_vm5, %v2078_v57 }
 0x14c   : > { %2082 = vmatmul.msk.f32.gmra.mxu0 %vm479_vm5, %v2077_v50 }
 0x14f   : > { %v596_v61 = vpop.f32.mrf.mxu2  ;;  %v725_v62 = vpop.f32.mrf.mxu1 }
 0x150   : > { %v597_v1 = vadd.f32 %v596_v61, %v520_v27  ;;  %v628_v5 = vpop.f32.mrf.mxu3  ;;  %v738_v6 = vadd.f32 %v725_v62, %v620_v41 }
 0x151   : > { %v629_v4 = vadd.f32 %v628_v5, %v552_v28 }
 0x154   : > { %2083 = vmatmul.msk.f32.gmra.mxu0 %vm479_vm5, %v2078_v57 }
 0x157   : > { %v599_v7 = vpop.f32.mrf.mxu2  ;;  %v728_v8 = vpop.f32.mrf.mxu1 }
 0x158   : > { %v600_v37 = vadd.f32 %v599_v7, %v523_v36  ;;  %v833_v3 = vpop.f32.mrf.mxu3  ;;  %v740_v43 = vadd.f32 %v728_v8, %v623_v52 }
 0x159   : > { %v846_v9 = vadd.f32 %v833_v3, %v738_v6  ;;  %v696_v10 = vpop.f32.mrf.mxu0 }
 0x15a   : > { %v737_v63 = vadd.f32 %v696_v10, %v591_v51 }
 0x15f   : > { %v804_v32 = vpop.f32.mrf.mxu2  ;;  %v731_v42 = vpop.f32.mrf.mxu1 }
 0x160   : > { %v2758_v11 = vadd.f32 %v804_v32, %v737_v63  ;;  %v836_v12 = vpop.f32.mrf.mxu3  ;;  %v742_v13 = vadd.f32 %v731_v42, %v626_v60  ;;  %v1826_v60 = vld [vmem:[%s2941_s8 + $0x70] sm:$0xff]  ;;  %v1821_v32 = vld [vmem:[%s2941_s8 + $0x48] sm:$0xff] }
 0x161   : > { %v2760_v14 = vadd.f32 %v836_v12, %v740_v43  ;;  %v699_v15 = vpop.f32.mrf.mxu0  ;;  %1830 = vmatpush.msrb.mxu0 %v1826_v60  ;;  %v1822_v43 = vld [vmem:[%s2941_s8 + $0x50] sm:$0xff]  ;;  %v1398_v60 = vpop.permute.xlu0 %1397 }
 0x162   : > { %v739_v16 = vadd.f32 %v699_v15, %v594_v58 }
 0x167   : > { %v807_v17 = vpop.f32.mrf.mxu2  ;;  %v734_v19 = vpop.f32.mrf.mxu1 }
 0x168   : > { %v2762_v20 = vadd.f32 %v807_v17, %v739_v16  ;;  %v839_v56 = vpop.f32.mrf.mxu3  ;;  %v744_v21 = vadd.f32 %v734_v19, %v629_v4  ;;  %v1824_v4 = vld [vmem:[%s2941_s8 + $0x60] sm:$0xff] }
 0x169   : > { %v2764_v55 = vadd.f32 %v839_v56, %v742_v13  ;;  %v702_v22 = vpop.f32.mrf.mxu0  ;;  %v1388_v13 = vpop.permute.xlu1 %1387  ;;  %v1820_v16 = vld [vmem:[%s2941_s8 + $0x40] sm:$0xff] }
 0x16a   : > { %v741_v23 = vadd.f32 %v702_v22, %v597_v1  ;;  %v1825_v1 = vld [vmem:[%s2941_s8 + $0x68] sm:$0xff] }
 0x16b   : > { %1831 = vmatpush.msrb.mxu0 %v1825_v1 }
 0x16d   : > { %1832 = vmatpush.msrb.mxu0 %v1824_v4 }
 0x16f   : > { %v810_v25 = vpop.f32.mrf.mxu2  ;;  %v935_v26 = vpop.f32.mrf.mxu1 }
 0x170   : > { %v2766_v27 = vadd.f32 %v810_v25, %v741_v23  ;;  %v842_v28 = vpop.f32.mrf.mxu3  ;;  %v948_v5 = vadd.f32 %v935_v26, %v846_v9  ;;  %v1818_v25 = vld [vmem:[%s2941_s8 + $0x30] sm:$0xff] }
 0x171   : > { %v2768_v29 = vadd.f32 %v842_v28, %v744_v21  ;;  %v705_v30 = vpop.f32.mrf.mxu0 }
 0x172   : > { %v743_v31 = vadd.f32 %v705_v30, %v600_v37  ;;  %v1823_v37 = vld [vmem:[%s2941_s8 + $0x58] sm:$0xff]  ;;  %v1393_v30 = vpop.permute.xlu2 %1392 }
 0x173   : > { %1833 = vmatpush.msrb.mxu0 %v1823_v37  ;;  %v1812_v37 = vld [vmem:[%s2941_s8] sm:$0xff] }
 0x175   : > { %1834 = vmatpush.msrb.mxu0 %v1822_v43 }
 0x177   : > { %v813_v33 = vpop.f32.mrf.mxu2  ;;  %v938_v34 = vpop.f32.mrf.mxu1  ;;  %1835 = vmatpush.msrb.mxu0 %v1821_v32 }
 0x178   : > { %v2770_v47 = vadd.f32 %v813_v33, %v743_v31  ;;  %v1043_v49 = vpop.f32.mrf.mxu3  ;;  %v950_v42 = vadd.f32 %v938_v34, %v2760_v14  ;;  %v1819_v14 = vld [vmem:[%s2941_s8 + $0x38] sm:$0xff]  ;;  %v1817_v33 = vld [vmem:[%s2941_s8 + $0x28] sm:$0xff] }
 0x179   : > { %v906_v35 = vpop.f32.mrf.mxu0  ;;  %v1056_v7 = vadd.f32 %v1043_v49, %v948_v5  ;;  %1836 = vmatpush.msrb.mxu0 %v1820_v16  ;;  %v1813_v5 = vld [vmem:[%s2941_s8 + $0x8] sm:$0xff] }
 0x17a   : > { %v947_v17 = vadd.f32 %v906_v35, %v2758_v11 }
 0x17b   : > { %1837 = vmatpush.msrb.mxu0 %v1819_v14 }
 0x17d   : > { %1838 = vmatpush.msrb.mxu0 %v1818_v25 }
 0x17f   : > { %v1014_v36 = vpop.f32.mrf.mxu2  ;;  %v2772_v24 = vpop.f32.mrf.mxu1  ;;  %1839 = vmatpush.msrb.mxu0 %v1817_v33 }
 0x180   : > { %v1046_v38 = vpop.f32.mrf.mxu3  ;;  %v1055_v21 = vadd.f32 %v1014_v36, %v947_v17  ;;  %v952_v34 = vadd.f32 %v2772_v24, %v2764_v55  ;;  %v1815_v55 = vld [vmem:[%s2941_s8 + $0x18] sm:$0xff]  ;;  %v1403_v17 = vpop.permute.xlu1 %1402 }
 0x181   : > { %v2774_v39 = vpop.f32.mrf.mxu0  ;;  %v1058_v19 = vadd.f32 %v1046_v38, %v950_v42  ;;  %v1816_v38 = vld [vmem:[%s2941_s8 + $0x20] sm:$0xff] }
 0x182   : > { %1840 = vmatpush.msrb.mxu0 %v1816_v38 }
 0x184   : > { %1841 = vmatpush.msrb.mxu0 %v1815_v55 }
 0x187   : > { %v2776_v41 = vpop.f32.mrf.mxu2  ;;  %v2778_v0 = vpop.f32.mrf.mxu1 }
 0x188   : > { %v2780_v45 = vpop.f32.mrf.mxu3  ;;  %v954_v4 = vadd.f32 %v2778_v0, %v2768_v29 }
 0x189   : > { %v2782_v2 = vpop.f32.mrf.mxu0 }
 0x18f   : > { %v2784_v46 = vpop.f32.mrf.mxu2  ;;  %v1151_v48 = vpop.f32.mrf.mxu1 }
 0x190   : > { %v2786_v50 = vpop.f32.mrf.mxu3  ;;  %v1164_v3 = vadd.f32 %v1151_v48, %v1056_v7  ;;  %v949_v48 = vadd.f32 %v2774_v39, %v2762_v20  ;;  %v1814_v20 = vld [vmem:[%s2941_s8 + $0x10] sm:$0xff] }
 0x191   : > { %v2788_v51 = vpop.f32.mrf.mxu0  ;;  %1842 = vmatpush.msrb.mxu0 %v1814_v20 }
 0x192   : > { %v1057_v24 = vadd.f32 %v2776_v41, %v949_v48  ;;  %v1790_v41 = vld [vmem:[%s2940_s7] sm:$0x1] }
 0x193   : > { %1843 = vmatpush.msrb.mxu0 %v1813_v5 }
 0x195   : > { %1844 = vmatpush.msrb.mxu0 %v1812_v37 }
 0x197   : > { %v2790_v18 = vpop.f32.mrf.mxu2  ;;  %v1154_v52 = vpop.f32.mrf.mxu1 }
 0x198   : > { %v1253_v40 = vpop.f32.mrf.mxu3  ;;  %v1166_v22 = vadd.f32 %v1154_v52, %v1058_v19  ;;  %v1060_v52 = vadd.f32 %v2780_v45, %v952_v34 }
 0x199   : > { %v1122_v53 = vpop.f32.mrf.mxu0  ;;  %v1266_v9 = vadd.f32 %v1253_v40, %v1164_v3  ;;  %v951_v3 = vadd.f32 %v2782_v2, %v2766_v27 }
 0x19a   : > { %v1163_v26 = vadd.f32 %v1122_v53, %v1055_v21 }
 0x19b   : > { %v1059_v0 = vadd.f32 %v2784_v46, %v951_v3  ;;  %v953_v46 = vadd.f32 %v2788_v51, %v2770_v47 }
 0x19d   : > { %v1061_v21 = vadd.f32 %v2790_v18, %v953_v46 }
 0x19f   : > { %v1224_v44 = vpop.f32.mrf.mxu2  ;;  %v2792_v54 = vpop.f32.mrf.mxu1 }
 0x1a0   : > { %v1256_v57 = vpop.f32.mrf.mxu3  ;;  %v1265_v49 = vadd.f32 %v1224_v44, %v1163_v26  ;;  %v1168_v44 = vadd.f32 %v2792_v54, %v1060_v52 }
 0x1a1   : > { %v2794_v58 = vpop.f32.mrf.mxu0  ;;  %v1268_v28 = vadd.f32 %v1256_v57, %v1166_v22 }
 0x1a2   : > { %v1165_v39 = vadd.f32 %v2794_v58, %v1057_v24 }
 0x1a7   : > { %v2802_v61 = vpop.f32.mrf.mxu2  ;;  %v2804_v62 = vpop.f32.mrf.mxu1 }
 0x1a8   : > { %v1259_v8 = vpop.f32.mrf.mxu3  ;;  %v1267_v58 = vadd.f32 %v2802_v61, %v1165_v39 }
 0x1a9   : > { %v2809_v6 = vpop.f32.mrf.mxu0  ;;  %v1270_v45 = vadd.f32 %v1259_v8, %v1168_v44 }
 0x1af   : > { %v2821_v10 = vpop.f32.mrf.mxu2  ;;  %v1361_v63 = vpop.f32.mrf.mxu1 }
 0x1b0   : > { %v1374_v12 = vadd.f32 %v1361_v63, %v1266_v9  ;;  %v1262_v23 = vpop.f32.mrf.mxu3  ;;  %v1062_v9 = vadd.f32 %v2786_v50, %v954_v4 }
 0x1b1   : > { %v2827_v15 = vpop.f32.mrf.mxu0 }
 0x1b2   : > { %v1406_v56 = vadd.f32 %v1388_v13, %v1374_v12  ;;  %v1170_v61 = vadd.f32 %v2804_v62, %v1062_v9 }
 0x1b4   : > { %1414 = vst [vmem:[%s2832_s22 + $0x8] sm:$0xff] %v1406_v56  ;;  %v1272_v16 = vadd.f32 %v1262_v23, %v1170_v61  ;;  %v1169_v23 = vadd.f32 %v2827_v15, %v1061_v21 }
 0x1b7   : > { %v2845_v11 = vpop.f32.mrf.mxu2  ;;  %v1364_v31 = vpop.f32.mrf.mxu1 }
 0x1b8   : > { %v1376_v35 = vadd.f32 %v1364_v31, %v1268_v28  ;;  %v1787_v59 = vpop.f32.mrf.mxu3 }
 0x1b9   : > { %v1332_v36 = vpop.f32.mrf.mxu0 }
 0x1ba   : > { %v1373_v40 = vadd.f32 %v1332_v36, %v1265_v49  ;;  %v1408_v53 = vadd.f32 %v1393_v30, %v1376_v35  ;;  %v1828_v36 = vld [vmem:[%s2942_s9] sm:$0x1] }
 0x1bc   : > { %v1405_v57 = vadd.f32 %v1388_v13, %v1373_v40  ;;  %1416 = vst [vmem:[%s2832_s22 + $0x18] sm:$0xff] %v1408_v53  ;;  %v1167_v13 = vadd.f32 %v2809_v6, %v1059_v0 }
 0x1be   : > { %1413 = vst [vmem:[%s2832_s22] sm:$0xff] %v1405_v57  ;;  %v1269_v2 = vadd.f32 %v2821_v10, %v1167_v13  ;;  %v1271_v10 = vadd.f32 %v2845_v11, %v1169_v23 }
 0x1bf   : > { %v1764_v1 = vpop.f32.mrf.mxu2  ;;  %v1367_v54 = vpop.f32.mrf.mxu1 }
 0x1c0   : > { %v1788_v7 = vadd.f32 %v1787_v59, %v1764_v1  ;;  %v1378_v8 = vadd.f32 %v1367_v54, %v1270_v45 }
 0x1c1   : > { %v1335_v43 = vpop.f32.mrf.mxu0 }
 0x1c2   : > { %v1791_v63 = vadd.f32 %v1790_v41, %v1788_v7  ;;  %v1375_v32 = vadd.f32 %v1335_v43, %v1267_v58  ;;  %v1410_v29 = vadd.f32 %v1398_v60, %v1378_v8 }
 0x1c4   : > { %v2097_v42 = vmul.f32 -1.442695, %v1791_v63  ;;  %v1407_v12 = vadd.f32 %v1393_v30, %v1375_v32  ;;  %1418 = vst [vmem:[%s2832_s22 + $0x28] sm:$0xff] %v1410_v29 }
 0x1c6   : > { %2161 = vpow2.f32 %v2097_v42  ;;  %1415 = vst [vmem:[%s2832_s22 + $0x10] sm:$0xff] %v1407_v12 }
 0x1c7   : > { %v1370_v27 = vpop.f32.mrf.mxu1 }
 0x1c8   : > { %v1380_v50 = vadd.f32 %v1370_v27, %v1272_v16 }
 0x1c9   : > { %v1338_v19 = vpop.f32.mrf.mxu0 }
 0x1ca   : > { %v1377_v62 = vadd.f32 %v1338_v19, %v1269_v2  ;;  %v1412_v56 = vadd.f32 %v1403_v17, %v1380_v50 }
 0x1cc   : > { %v2162_v14 = vpop.eup %2161  ;;  %v1409_v6 = vadd.f32 %v1398_v60, %v1377_v62  ;;  %1420 = vst [vmem:[%s2832_s22 + $0x38] sm:$0xff] %v1412_v56 }
 0x1cd   : > { %v1795_v22 = vadd.f32 1.0, %v2162_v14 }
 0x1ce   : > { %1417 = vst [vmem:[%s2832_s22 + $0x20] sm:$0xff] %v1409_v6 }
 0x1cf   : > { %2163 = vrcp.f32 %v1795_v22  ;;  %v1807_v31 = vand.u32 2147483648, %v1795_v22  ;;  %v1805_v33 = vand.u32 2147483647, %v1795_v22  ;;  %vm1801_vm9 = vweird.f32 %v1795_v22 }
 0x1d1   : > { %v1341_v25 = vpop.f32.mrf.mxu0  ;;  %v1808_v15 = vor.u32 1.1754944e-38, %v1807_v31  ;;  %vm1806_vm11 = vcmp.eq.f32.partialorder %v1805_v33, 8.507059e+37 }
 0x1d2   : > { %v1379_v26 = vadd.f32 %v1341_v25, %v1271_v10 }
 0x1d4   : > { %v1411_v28 = vadd.f32 %v1403_v17, %v1379_v26 }
 0x1d5   : > { %v2164_v30 = vpop.eup %2163 }
 0x1d6   : > { %v1797_v47 = vmul.f32 %v2164_v30, %v1795_v22  ;;  %1419 = vst [vmem:[%s2832_s22 + $0x30] sm:$0xff] %v1411_v28  ;;  %vm1802_vm5 = vweird.f32 %v2164_v30  ;;  %s1867_s22 = scalar_lea.hbm %s2944_s11, %s2325_s21 }
 0x1d7   : > { %vm1803_vm10 = vmor %vm1801_vm9, %vm1802_vm5  ;;  %s1871_s29 = sshll.u32 %s1867_s22, 4  ;;  %s1872_s29 = int_to_ptr.hbm [resolvable:$true] %s1871_s29 }
 0x1d8   : > { %v1798_v51 = vsub.f32 1.0, %v1797_v47  ;;  %s2179_s0 = sshra.s32 %s1872_s29, 4  ;;  %s2180_s0 = int_to_ptr.hbm [resolvable:$true] %s2179_s0 }
 0x1d9   : > { %s2181_s1 = scalar_lea.hbm %s2180_s0, 1  ;;  %p2186_p0 = scmp.lt.s32.totalorder %s2180_s0, %s2944_s11 }
 0x1da   : > { %v1799_v18 = vmul.f32 %v2164_v30, %v1798_v51  ;;  %p2182_p11 = scmp.ne.s32.totalorder %s2180_s0, %s2181_s1  ;;  %p2187_p1 = scmp.lt.s32.totalorder %s2185_s12, %s2181_s1 }
 0x1dc   : > { %v1800_v34 = vadd.f32 %v2164_v30, %v1799_v18  ;;  %p2183_p12 = pnand %p2182_p11, %p2342_p5  ;;  %p2188_p2 = por %p2187_p1, %p2186_p0 }
 0x1de   : > { %v1804_v49 = vsel %vm1803_vm10, %v2164_v30, %v1800_v34  ;;  %p2184_p13 = pneg %p2183_p12 }
 0x1df   : > { %v1809_v11 = vsel %vm1806_vm11, %v1808_v15, %v1804_v49 }
 0x1e0   : > { %v1811_v35 = vmul.f32 %v1809_v11, %v1791_v63  ;;  %p2189_p3 = pnand %p2188_p2, %p2184_p13 }
 0x1e2   : > { %1845 = vmatmul.f32.vlgmr.msrb.gmra.mxu0 %v1811_v35 }
 0x25f   : > { %v1846_v38 = vpop.f32.mrf.mxu0 }
 0x260   : > { %v1847_v48 = vadd.f32 %v1846_v38, %v1828_v36 }
 0x262   : > { %1849 = vst [vmem:[%s397_s15] sm:$0x1] %v1847_v48 }
 0x263   : > { %2192 = shalt.err (!%p2189_p3)
}
 0x264   : > { %2104 = dma.vmem_to_hbm [thread:$0]  (%p2342_p5), %s1870_s16, 16, %s1872_s29, %s1856_s24  }
 0x265 PF: > { %p2110_p4 = scmp.ge.s32.totalorder %s2227_s20, 2  ;;  %s1891_s25 = sand.u32 1, %s2215_s17  }
 0x266   : > { %s1892_s22 = scalar_lea.sflag [#allocation3], %s1891_s25 }
 0x267   : > { %p2107_p7 = pnand %p2110_p4, %p2346_p6 }
 0x269   : > { %p2108_p8 = pneg %p2107_p7 }
 0x26b   : > { %2210 = dma.done.wait (%p2108_p8), %s1892_s22, 16  }
 0x26c   : > { %2212 = vsyncadd (%p2108_p8), %s1892_s22, 4294967280  ;;  %p22_p9 = scmp.ge.s32.totalorder %s2329_s23, 4   ;;  %s2961_s17 = smov %s2219_s18 }
 0x26d   : > { %s2962_s18 = smov %s2223_s19  ;;  %s2963_s19 = smov %s2340_s26 }
 0x26e   : > { %s2964_s20 = smov %s2329_s23  ;;  %24 = sbr.rel (!%p22_p9) target bundleno = 6 (0x6), region = 126 }
 0x273   :  { %1897 = vsyncpa [#allocation3], 1 }
 0x274   :  { %1899 = vsyncpa [#allocation3 + $0x1], 1 }

</bundles_post_ra>
